<compile_context>
chip_gen: v6e
topology: v6e:2x2x1
jax: 0.10.0
libtpu: 0.0.40
codegen_flags: <defaults>
</compile_context>

<pallas_src>
import functools

import jax
import jax.numpy as jnp
from jax.experimental import pallas as pl
from jax.experimental.pallas import tpu as pltpu


def _round_up(x, m):
    return (x + m - 1) // m * m


def _device_kind():
    try:
        return jax.devices()[0].device_kind.lower()
    except Exception:  # pragma: no cover
        return ""


def _choose_tiles(n, cp, compute_bytes, out_bytes, batch, kind):
    """Pick (TQ, TK, Np, vmem_limit) from an explicit VMEM byte budget."""
    f32b = 4
    big_vmem = ("v5" in kind) or ("v6" in kind)        # 128 MiB physical VMEM
    vmem_limit = (96 if big_vmem else 48) * 1024 * 1024
    budget = vmem_limit - 8 * 1024 * 1024              # compiler headroom

    def cost(tq, tk):
        weights = 2 * (2 * cp * cp * compute_bytes + 2 * cp * f32b + tk * f32b)
        xq = 2 * tq * cp * compute_bytes               # query/residual tile (dbl buf)
        kv = 2 * tk * cp * compute_bytes               # key/value tile (dbl buf)
        out = 2 * tq * cp * out_bytes                  # output tile (dbl buf)
        scratch = tq * cp * (f32b + compute_bytes) + 2 * tq * 128 * f32b
        inter = 5 * tq * tk * f32b                     # energy / p / temporaries
        return weights + xq + kv + out + scratch + inter

    n128 = _round_up(n, 128)
    tq_cands = [t for t in (1024, 512, 256, 128) if t <= n128] or [128]
    if batch == 1 and "v7" in kind:
        # 2 TensorCores/chip: keep >= 2 query tiles so the parallel q axis splits.
        cap = max(128, _round_up((n + 1) // 2, 128))
        tq_cands = sorted({min(t, cap) for t in tq_cands}, reverse=True)

    tq = tq_cands[-1]
    for t in tq_cands:                                 # descending: first fit = largest
        if cost(t, t) <= budget:
            tq = t
            break

    np_ = _round_up(n, tq)
    num_q = np_ // tq
    tk = tq
    for m in range(num_q, 0, -1):                      # prefer full KV residency
        if num_q % m == 0 and cost(tq, m * tq) <= budget:
            tk = m * tq
            break
    return tq, tk, np_, vmem_limit


def _self_attn_kernel(xq_ref, xkv_ref, mask_ref, m_ref, u_ref, wv_ref, bv_ref,
                      o_ref, qm_sc, m_sc, l_sc, acc_sc, *,
                      exp_in_low_precision, approx_recip):
    """One (batch, query-tile, kv-tile) grid step.

    xq_ref  : (1, TQ, Cp) query rows (also the residual), compute dtype
    xkv_ref : (1, TK, Cp) key/value source rows, compute dtype
    mask_ref: (1, TK)     additive key-padding mask (0 valid / -1e30 padded), f32
    m_ref   : (Cp, Cp)    folded Wq^T Wk
    u_ref   : (1, Cp)     folded Wk^T bq (f32)
    wv_ref  : (Cp, Cp)    gamma * Wv^T
    bv_ref  : (1, Cp)     gamma * bv (f32)
    o_ref   : (1, TQ, Cp) output tile, input dtype
    qm_sc   : (TQ, Cp)    folded query scores (constant across kv steps)
    m_sc/l_sc: (TQ, 1)    online-softmax running max / denominator (f32)
    acc_sc  : (TQ, Cp)    unnormalized context accumulator (f32)
    """
    k_step = pl.program_id(2)

    @pl.when(k_step == 0)
    def _():
        # Folded Q/K projection for this query tile: qm = xq @ (Wq^T Wk) + Wk^T bq.
        qm = jnp.dot(xq_ref[0], m_ref[...],
                     preferred_element_type=jnp.float32) + u_ref[...]
        qm_sc[...] = qm.astype(qm_sc.dtype)
        m_sc[...] = jnp.full_like(m_sc, -jnp.inf)
        l_sc[...] = jnp.zeros_like(l_sc)
        acc_sc[...] = jnp.zeros_like(acc_sc)

    xkv = xkv_ref[0]                                           # (TK, Cp)

    # Scores for this (query, key) tile pair: channel contraction on the MXU,
    # then a single broadcast add for the key-padding mask.
    energy = jax.lax.dot_general(
        qm_sc[...], xkv, (((1,), (1,)), ((), ())),
        preferred_element_type=jnp.float32)                    # (TQ, TK) f32
    energy = energy + mask_ref[...]

    # Online (flash-style) softmax update; statistics stay in f32.
    m_prev = m_sc[...]
    m_new = jnp.maximum(m_prev, jnp.max(energy, axis=-1, keepdims=True))
    alpha = jnp.exp(m_prev - m_new)
    shifted = energy - m_new
    if exp_in_low_precision:
        p = jnp.exp(shifted.astype(xkv.dtype))                 # bf16 EUP path (v6e/v7x)
    else:
        p = jnp.exp(shifted)
    l_sc[...] = alpha * l_sc[...] + jnp.sum(p.astype(jnp.float32),
                                            axis=-1, keepdims=True)
    acc_sc[...] = alpha * acc_sc[...] + jnp.dot(
        p.astype(xkv.dtype), xkv, preferred_element_type=jnp.float32)
    m_sc[...] = m_new

    @pl.when(k_step == pl.num_programs(2) - 1)
    def _():
        # Finalize: normalize, apply the folded (gamma-scaled) value projection,
        # add the residual, and store once in the input dtype.
        inv = pl.reciprocal(l_sc[...], approx=approx_recip)
        ctx = acc_sc[...] * inv                                # (TQ, Cp) f32
        out = jnp.dot(ctx.astype(wv_ref.dtype), wv_ref[...],
                      preferred_element_type=jnp.float32) + bv_ref[...]
        o_ref[0] = (out + xq_ref[0].astype(jnp.float32)).astype(o_ref.dtype)


def self_attention_pallas(x_nchw, wq, bq, wk, bk, wv, bv, gamma, *,
                          compute_dtype=jnp.bfloat16):
    """SAGAN SelfAttention forward.  x_nchw: (B, C, W, H); conv weights in
    PyTorch (out, in) layout (flattened from (out, in, 1, 1)).  compute_dtype
    sets the MXU input precision (bf16 default); accumulation / softmax /
    residual stay f32.  `bk` only shifts each query row's energies by a
    constant, so it cancels under softmax (kept for API parity)."""
    del bk
    B, C, W, H = x_nchw.shape
    N = W * H
    in_dtype = x_nchw.dtype
    cdt = jnp.dtype(compute_dtype)
    f32 = jnp.float32

    Cp = _round_up(C, 128)                             # lane-dense channels
    kind = _device_kind()
    TQ, TK, Np, vmem_limit = _choose_tiles(
        N, Cp, cdt.itemsize, jnp.dtype(in_dtype).itemsize, B, kind)
    num_q, num_k = Np // TQ, Np // TK

    # NCHW -> (B, N, C) channels-last, zero padded to (B, Np, Cp).
    x_flat = jnp.transpose(x_nchw.reshape(B, C, N), (0, 2, 1))
    x_p = jnp.pad(x_flat, ((0, 0), (0, Np - N), (0, Cp - C))).astype(cdt)

    wq32, wk32, wv32 = wq.astype(f32), wk.astype(f32), wv.astype(f32)
    g = jnp.asarray(gamma, f32).reshape(())
    # Fold Q/K: energy = x (Wq^T Wk) x_key^T + (Wk^T bq)·x_key  (row-constant
    # bias terms cancel under softmax).  Fold gamma into the V projection.
    m_fold = wq32.T @ wk32                             # (C, C)
    u_fold = wk32.T @ bq.astype(f32)                   # (C,)
    m_p = jnp.zeros((Cp, Cp), f32).at[:C, :C].set(m_fold).astype(cdt)
    u_p = jnp.zeros((1, Cp), f32).at[0, :C].set(u_fold)
    wv_p = jnp.zeros((Cp, Cp), f32).at[:C, :C].set(wv32.T * g).astype(cdt)
    bv_p = jnp.zeros((1, Cp), f32).at[0, :C].set(bv.astype(f32) * g)
    # Additive key-padding mask: 0 for valid key columns, -1e30 for padded.
    mask = jnp.where(jnp.arange(Np) < N, 0.0, -1e30).astype(f32).reshape(1, Np)

    exp_low = (cdt == jnp.dtype(jnp.bfloat16)) and ("v5" not in kind)
    kernel = functools.partial(
        _self_attn_kernel,
        exp_in_low_precision=exp_low,
        approx_recip=(cdt != jnp.dtype(jnp.float32)))

    out_p = pl.pallas_call(
        kernel,
        out_shape=jax.ShapeDtypeStruct((B, Np, Cp), in_dtype),
        grid_spec=pltpu.PrefetchScalarGridSpec(
            num_scalar_prefetch=0,
            grid=(B, num_q, num_k),
            in_specs=[
                pl.BlockSpec((1, TQ, Cp), lambda b, q, k: (b, q, 0)),  # query / residual
                pl.BlockSpec((1, TK, Cp), lambda b, q, k: (b, k, 0)),  # key/value source
                pl.BlockSpec((1, TK), lambda b, q, k: (0, k)),         # key-pad mask
                pl.BlockSpec((Cp, Cp), lambda b, q, k: (0, 0)),        # Wq^T Wk
                pl.BlockSpec((1, Cp), lambda b, q, k: (0, 0)),         # Wk^T bq
                pl.BlockSpec((Cp, Cp), lambda b, q, k: (0, 0)),        # gamma * Wv^T
                pl.BlockSpec((1, Cp), lambda b, q, k: (0, 0)),         # gamma * bv
            ],
            out_specs=pl.BlockSpec((1, TQ, Cp), lambda b, q, k: (b, q, 0)),
            scratch_shapes=[
                pltpu.VMEM((TQ, Cp), cdt),             # folded query scores
                pltpu.VMEM((TQ, 1), f32),              # running max
                pltpu.VMEM((TQ, 1), f32),              # running denominator
                pltpu.VMEM((TQ, Cp), f32),             # context accumulator
            ]),
        compiler_params=pltpu.CompilerParams(
            dimension_semantics=("parallel", "parallel", "arbitrary"),
            vmem_limit_bytes=vmem_limit),
    )(x_p, x_p, mask, m_p, u_p, wv_p, bv_p)

    out = out_p[:, :N, :C]                             # drop row/channel padding
    return jnp.transpose(out, (0, 2, 1)).reshape(B, C, W, H)


def self_attention_ref(x_nchw, wq, bq, wk, bk, wv, bv, gamma):
    """Pure-JAX reference mirroring the PyTorch forward exactly."""
    B, C, W, H = x_nchw.shape
    N = W * H
    xf = x_nchw.reshape(B, C, N)                                     # (B, C, N)
    q = jnp.einsum('oc,bcn->bon', wq, xf) + bq[None, :, None]        # (B, C8, N)
    k = jnp.einsum('oc,bcn->bon', wk, xf) + bk[None, :, None]        # (B, C8, N)
    v = jnp.einsum('oc,bcn->bon', wv, xf) + bv[None, :, None]        # (B, C,  N)
    energy = jnp.einsum('bcn,bcm->bnm', q, k)                        # (B, N, N)
    attn = jax.nn.softmax(energy, axis=-1)
    out = jnp.einsum('bcm,bnm->bcn', v, attn).reshape(B, C, W, H)
    return gamma * out + x_nchw


if __name__ == "__main__":
    key = jax.random.PRNGKey(0)
    B, C, W, H = 2, 16, 8, 8          # in_channels=16 -> C//8 = 2
    C8 = C // 8

    ks = jax.random.split(key, 8)
    x = jax.random.normal(ks[0], (B, C, W, H), jnp.float32)

    # Conv2d(k=1) weights, PyTorch layout (out, in, 1, 1) -> flattened (out, in)
    scale = 1.0 / jnp.sqrt(C)
    wq = jax.random.uniform(ks[1], (C8, C), jnp.float32, -scale, scale)
    bq = jax.random.uniform(ks[2], (C8,), jnp.float32, -scale, scale)
    wk = jax.random.uniform(ks[3], (C8, C), jnp.float32, -scale, scale)
    bk = jax.random.uniform(ks[4], (C8,), jnp.float32, -scale, scale)
    wv = jax.random.uniform(ks[5], (C, C), jnp.float32, -scale, scale)
    bv = jax.random.uniform(ks[6], (C,), jnp.float32, -scale, scale)
    # PyTorch inits gamma to 0 (residual passthrough); use a nonzero value so
    # the attention path is actually exercised numerically.
    gamma = jnp.float32(0.5)

    ref = self_attention_ref(x, wq, bq, wk, bk, wv, bv, gamma)

    # 1) f32 validation path (exact-precision matmuls, exact reciprocal).
    out_f32 = jax.block_until_ready(
        self_attention_pallas(x, wq, bq, wk, bk, wv, bv, gamma,
                              compute_dtype=jnp.float32))
    assert out_f32.shape == (B, C, W, H)
    assert jnp.allclose(out_f32, ref, atol=1e-4, rtol=1e-4), "f32 path mismatch"

    # 2) bf16 performance path (MXU inputs bf16, f32 accumulation/softmax).
    out_bf16 = jax.block_until_ready(
        self_attention_pallas(x, wq, bq, wk, bk, wv, bv, gamma,
                              compute_dtype=jnp.bfloat16))
    assert out_bf16.shape == (B, C, W, H)
    assert jnp.allclose(out_bf16, ref, atol=5e-2, rtol=5e-2), "bf16 path mismatch"

    print("KERNEL_OK")
</pallas_src>

<mosaic_0001>
module attributes {stable_mosaic.version = 11 : i64} {
  func.func @_self_attn_kernel(%arg0: i32, %arg1: i32, %arg2: i32, %arg3: memref<1x128x128xf32, #tpu.memory_space<vmem>>, %arg4: memref<1x128x128xf32, #tpu.memory_space<vmem>>, %arg5: memref<1x128xf32, #tpu.memory_space<vmem>>, %arg6: memref<128x128xf32, #tpu.memory_space<vmem>>, %arg7: memref<1x128xf32, #tpu.memory_space<vmem>>, %arg8: memref<128x128xf32, #tpu.memory_space<vmem>>, %arg9: memref<1x128xf32, #tpu.memory_space<vmem>>, %arg10: memref<1x128x128xf32, #tpu.memory_space<vmem>>, %arg11: memref<128x128xf32, #tpu.memory_space<vmem>>, %arg12: memref<128x1xf32, #tpu.memory_space<vmem>>, %arg13: memref<128x1xf32, #tpu.memory_space<vmem>>, %arg14: memref<128x128xf32, #tpu.memory_space<vmem>>) attributes {dimension_semantics = [#tpu.dimension_semantics<parallel>, #tpu.dimension_semantics<parallel>, #tpu.dimension_semantics<arbitrary>], iteration_bounds = array<i64: 2, 1, 1>, scalar_prefetch = 0 : i64, scratch_operands = 4 : i64, tpu.core_type = #tpu.core_type<tc>, window_params = [{transform_indices = @transform_0, window_bounds = array<i64: 1, 128, 128>}, {transform_indices = @transform_1, window_bounds = array<i64: 1, 128, 128>}, {transform_indices = @transform_2, window_bounds = array<i64: 1, 128>}, {pipeline_mode = #tpu.pipeline_mode<synchronous>, transform_indices = @transform_3, window_bounds = array<i64: 128, 128>}, {pipeline_mode = #tpu.pipeline_mode<synchronous>, transform_indices = @transform_4, window_bounds = array<i64: 1, 128>}, {pipeline_mode = #tpu.pipeline_mode<synchronous>, transform_indices = @transform_5, window_bounds = array<i64: 128, 128>}, {pipeline_mode = #tpu.pipeline_mode<synchronous>, transform_indices = @transform_6, window_bounds = array<i64: 1, 128>}, {transform_indices = @transform_7, window_bounds = array<i64: 1, 128, 128>}]} {
    %c0_i32 = arith.constant 0 : i32
    %0 = arith.cmpi eq, %arg2, %c0_i32 : i32
    %1 = arith.extui %0 : i1 to i32
    %c0_i32_0 = arith.constant 0 : i32
    %2 = arith.cmpi ne, %1, %c0_i32_0 : i32
    scf.if %2 {
      %c0_24 = arith.constant 0 : index
      %c0_25 = arith.constant 0 : index
      %c0_26 = arith.constant 0 : index
      %35 = vector.load %arg3[%c0_24, %c0_25, %c0_26] : memref<1x128x128xf32, #tpu.memory_space<vmem>>, vector<1x128x128xf32>
      %36 = vector.shape_cast %35 : vector<1x128x128xf32> to vector<128x128xf32>
      %c0_27 = arith.constant 0 : index
      %c0_28 = arith.constant 0 : index
      %37 = vector.load %arg6[%c0_27, %c0_28] : memref<128x128xf32, #tpu.memory_space<vmem>>, vector<128x128xf32>
      %cst_29 = arith.constant dense<0.000000e+00> : vector<128x128xf32>
      %38 = tpu.matmul %36, %37, %cst_29 {dimension_numbers = #tpu.dot_dimension_numbers<[1], [0], [0], [1], [0, 0, 1, 1], [], []>} : vector<128x128xf32>, vector<128x128xf32>, vector<128x128xf32> -> vector<128x128xf32>
      %c0_30 = arith.constant 0 : index
      %c0_31 = arith.constant 0 : index
      %39 = vector.load %arg7[%c0_30, %c0_31] : memref<1x128xf32, #tpu.memory_space<vmem>>, vector<1x128xf32>
      %40 = vector.broadcast %39 : vector<1x128xf32> to vector<128x128xf32>
      %41 = arith.addf %38, %40 : vector<128x128xf32>
      %c0_32 = arith.constant 0 : index
      %c0_33 = arith.constant 0 : index
      %42 = vector.load %arg11[%c0_32, %c0_33] : memref<128x128xf32, #tpu.memory_space<vmem>>, vector<128x128xf32>
      tpu.vector_store %arg11[%c0_32, %c0_33], %41 {strides = array<i32>} : memref<128x128xf32, #tpu.memory_space<vmem>>, vector<128x128xf32>,
      %cst_34 = arith.constant 0xFF800000 : f32
      %43 = vector.broadcast %cst_34 : f32 to vector<128x1xf32>
      %c0_35 = arith.constant 0 : index
      %c0_36 = arith.constant 0 : index
      %44 = vector.load %arg12[%c0_35, %c0_36] : memref<128x1xf32, #tpu.memory_space<vmem>>, vector<128x1xf32>
      tpu.vector_store %arg12[%c0_35, %c0_36], %43 {strides = array<i32>} : memref<128x1xf32, #tpu.memory_space<vmem>>, vector<128x1xf32>,
      %cst_37 = arith.constant 0.000000e+00 : f32
      %45 = vector.broadcast %cst_37 : f32 to vector<128x1xf32>
      %c0_38 = arith.constant 0 : index
      %c0_39 = arith.constant 0 : index
      %46 = vector.load %arg13[%c0_38, %c0_39] : memref<128x1xf32, #tpu.memory_space<vmem>>, vector<128x1xf32>
      tpu.vector_store %arg13[%c0_38, %c0_39], %45 {strides = array<i32>} : memref<128x1xf32, #tpu.memory_space<vmem>>, vector<128x1xf32>,
      %cst_40 = arith.constant 0.000000e+00 : f32
      %47 = vector.broadcast %cst_40 : f32 to vector<128x128xf32>
      %c0_41 = arith.constant 0 : index
      %c0_42 = arith.constant 0 : index
      %48 = vector.load %arg14[%c0_41, %c0_42] : memref<128x128xf32, #tpu.memory_space<vmem>>, vector<128x128xf32>
      tpu.vector_store %arg14[%c0_41, %c0_42], %47 {strides = array<i32>} : memref<128x128xf32, #tpu.memory_space<vmem>>, vector<128x128xf32>,
    } else {
    }
    %c0 = arith.constant 0 : index
    %c0_1 = arith.constant 0 : index
    %c0_2 = arith.constant 0 : index
    %3 = vector.load %arg4[%c0, %c0_1, %c0_2] : memref<1x128x128xf32, #tpu.memory_space<vmem>>, vector<1x128x128xf32>
    %4 = vector.shape_cast %3 : vector<1x128x128xf32> to vector<128x128xf32>
    %c0_3 = arith.constant 0 : index
    %c0_4 = arith.constant 0 : index
    %5 = vector.load %arg11[%c0_3, %c0_4] : memref<128x128xf32, #tpu.memory_space<vmem>>, vector<128x128xf32>
    %cst = arith.constant dense<0.000000e+00> : vector<128x128xf32>
    %6 = tpu.matmul %5, %4, %cst {dimension_numbers = #tpu.dot_dimension_numbers<[1], [1], [0], [0], [0, 0, 1, 0], [], []>} : vector<128x128xf32>, vector<128x128xf32>, vector<128x128xf32> -> vector<128x128xf32>
    %c0_5 = arith.constant 0 : index
    %c0_6 = arith.constant 0 : index
    %7 = vector.load %arg5[%c0_5, %c0_6] : memref<1x128xf32, #tpu.memory_space<vmem>>, vector<1x128xf32>
    %8 = vector.broadcast %7 : vector<1x128xf32> to vector<128x128xf32>
    %9 = arith.addf %6, %8 : vector<128x128xf32>
    %c0_7 = arith.constant 0 : index
    %c0_8 = arith.constant 0 : index
    %10 = vector.load %arg12[%c0_7, %c0_8] : memref<128x1xf32, #tpu.memory_space<vmem>>, vector<128x1xf32>
    %cst_9 = arith.constant dense<0xFF800000> : vector<128xf32>
    %11 = vector.multi_reduction <maximumf>, %9, %cst_9 [1] : vector<128x128xf32> to vector<128xf32>
    %12 = vector.shape_cast %11 : vector<128xf32> to vector<128x1xf32>
    %13 = arith.maximumf %10, %12 : vector<128x1xf32>
    %14 = arith.subf %10, %13 : vector<128x1xf32>
    %15 = math.exp %14 : vector<128x1xf32>
    %16 = vector.broadcast %13 : vector<128x1xf32> to vector<128x128xf32>
    %17 = arith.subf %9, %16 : vector<128x128xf32>
    %18 = math.exp %17 : vector<128x128xf32>
    %c0_10 = arith.constant 0 : index
    %c0_11 = arith.constant 0 : index
    %19 = vector.load %arg13[%c0_10, %c0_11] : memref<128x1xf32, #tpu.memory_space<vmem>>, vector<128x1xf32>
    %20 = arith.mulf %15, %19 : vector<128x1xf32>
    %cst_12 = arith.constant dense<0.000000e+00> : vector<128xf32>
    %21 = vector.multi_reduction <add>, %18, %cst_12 [1] : vector<128x128xf32> to vector<128xf32>
    %22 = vector.shape_cast %21 : vector<128xf32> to vector<128x1xf32>
    %23 = arith.addf %20, %22 : vector<128x1xf32>
    %c0_13 = arith.constant 0 : index
    %c0_14 = arith.constant 0 : index
    %24 = vector.load %arg13[%c0_13, %c0_14] : memref<128x1xf32, #tpu.memory_space<vmem>>, vector<128x1xf32>
    tpu.vector_store %arg13[%c0_13, %c0_14], %23 {strides = array<i32>} : memref<128x1xf32, #tpu.memory_space<vmem>>, vector<128x1xf32>,
    %c0_15 = arith.constant 0 : index
    %c0_16 = arith.constant 0 : index
    %25 = vector.load %arg14[%c0_15, %c0_16] : memref<128x128xf32, #tpu.memory_space<vmem>>, vector<128x128xf32>
    %26 = vector.broadcast %15 : vector<128x1xf32> to vector<128x128xf32>
    %27 = arith.mulf %26, %25 : vector<128x128xf32>
    %cst_17 = arith.constant dense<0.000000e+00> : vector<128x128xf32>
    %28 = tpu.matmul %18, %4, %cst_17 {dimension_numbers = #tpu.dot_dimension_numbers<[1], [0], [0], [1], [0, 0, 1, 1], [], []>} : vector<128x128xf32>, vector<128x128xf32>, vector<128x128xf32> -> vector<128x128xf32>
    %29 = arith.addf %27, %28 : vector<128x128xf32>
    %c0_18 = arith.constant 0 : index
    %c0_19 = arith.constant 0 : index
    %30 = vector.load %arg14[%c0_18, %c0_19] : memref<128x128xf32, #tpu.memory_space<vmem>>, vector<128x128xf32>
    tpu.vector_store %arg14[%c0_18, %c0_19], %29 {strides = array<i32>} : memref<128x128xf32, #tpu.memory_space<vmem>>, vector<128x128xf32>,
    %c0_20 = arith.constant 0 : index
    %c0_21 = arith.constant 0 : index
    %31 = vector.load %arg12[%c0_20, %c0_21] : memref<128x1xf32, #tpu.memory_space<vmem>>, vector<128x1xf32>
    tpu.vector_store %arg12[%c0_20, %c0_21], %13 {strides = array<i32>} : memref<128x1xf32, #tpu.memory_space<vmem>>, vector<128x1xf32>,
    %c0_i32_22 = arith.constant 0 : i32
    %32 = arith.cmpi eq, %arg2, %c0_i32_22 : i32
    %33 = arith.extui %32 : i1 to i32
    %c0_i32_23 = arith.constant 0 : i32
    %34 = arith.cmpi ne, %33, %c0_i32_23 : i32
    scf.if %34 {
      %c0_24 = arith.constant 0 : index
      %c0_25 = arith.constant 0 : index
      %35 = vector.load %arg13[%c0_24, %c0_25] : memref<128x1xf32, #tpu.memory_space<vmem>>, vector<128x1xf32>
      %36 = tpu.reciprocal %35 : vector<128x1xf32> -> vector<128x1xf32>
      %c0_26 = arith.constant 0 : index
      %c0_27 = arith.constant 0 : index
      %37 = vector.load %arg14[%c0_26, %c0_27] : memref<128x128xf32, #tpu.memory_space<vmem>>, vector<128x128xf32>
      %38 = vector.broadcast %36 : vector<128x1xf32> to vector<128x128xf32>
      %39 = arith.mulf %37, %38 : vector<128x128xf32>
      %c0_28 = arith.constant 0 : index
      %c0_29 = arith.constant 0 : index
      %40 = vector.load %arg8[%c0_28, %c0_29] : memref<128x128xf32, #tpu.memory_space<vmem>>, vector<128x128xf32>
      %cst_30 = arith.constant dense<0.000000e+00> : vector<128x128xf32>
      %41 = tpu.matmul %39, %40, %cst_30 {dimension_numbers = #tpu.dot_dimension_numbers<[1], [0], [0], [1], [0, 0, 1, 1], [], []>} : vector<128x128xf32>, vector<128x128xf32>, vector<128x128xf32> -> vector<128x128xf32>
      %c0_31 = arith.constant 0 : index
      %c0_32 = arith.constant 0 : index
      %42 = vector.load %arg9[%c0_31, %c0_32] : memref<1x128xf32, #tpu.memory_space<vmem>>, vector<1x128xf32>
      %43 = vector.broadcast %42 : vector<1x128xf32> to vector<128x128xf32>
      %44 = arith.addf %41, %43 : vector<128x128xf32>
      %c0_33 = arith.constant 0 : index
      %c0_34 = arith.constant 0 : index
      %c0_35 = arith.constant 0 : index
      %45 = vector.load %arg3[%c0_33, %c0_34, %c0_35] : memref<1x128x128xf32, #tpu.memory_space<vmem>>, vector<1x128x128xf32>
      %46 = vector.shape_cast %45 : vector<1x128x128xf32> to vector<128x128xf32>
      %47 = arith.addf %44, %46 : vector<128x128xf32>
      %c0_36 = arith.constant 0 : index
      %c0_37 = arith.constant 0 : index
      %c0_38 = arith.constant 0 : index
      %48 = vector.load %arg10[%c0_36, %c0_37, %c0_38] : memref<1x128x128xf32, #tpu.memory_space<vmem>>, vector<1x128x128xf32>
      %49 = vector.shape_cast %48 : vector<1x128x128xf32> to vector<128x128xf32>
      %50 = vector.shape_cast %47 : vector<128x128xf32> to vector<1x128x128xf32>
      tpu.vector_store %arg10[%c0_36, %c0_37, %c0_38], %50 {strides = array<i32>} : memref<1x128x128xf32, #tpu.memory_space<vmem>>, vector<1x128x128xf32>,
    } else {
    }
    return
  }
  func.func @transform_0(%arg0: i32, %arg1: i32, %arg2: i32) -> (i32, i32, i32) {
    %c0_i32 = arith.constant 0 : i32
    %c0_i32_0 = arith.constant 0 : i32
    return %arg0, %arg1, %c0_i32 : i32, i32, i32
  }
  func.func @transform_1(%arg0: i32, %arg1: i32, %arg2: i32) -> (i32, i32, i32) {
    %c0_i32 = arith.constant 0 : i32
    %c0_i32_0 = arith.constant 0 : i32
    return %arg0, %arg2, %c0_i32 : i32, i32, i32
  }
  func.func @transform_2(%arg0: i32, %arg1: i32, %arg2: i32) -> (i32, i32) {
    %c0_i32 = arith.constant 0 : i32
    %c0_i32_0 = arith.constant 0 : i32
    return %c0_i32, %arg2 : i32, i32
  }
  func.func @transform_3(%arg0: i32, %arg1: i32, %arg2: i32) -> (i32, i32) {
    %c0_i32 = arith.constant 0 : i32
    %c0_i32_0 = arith.constant 0 : i32
    %c0_i32_1 = arith.constant 0 : i32
    return %c0_i32, %c0_i32_0 : i32, i32
  }
  func.func @transform_4(%arg0: i32, %arg1: i32, %arg2: i32) -> (i32, i32) {
    %c0_i32 = arith.constant 0 : i32
    %c0_i32_0 = arith.constant 0 : i32
    %c0_i32_1 = arith.constant 0 : i32
    return %c0_i32, %c0_i32_0 : i32, i32
  }
  func.func @transform_5(%arg0: i32, %arg1: i32, %arg2: i32) -> (i32, i32) {
    %c0_i32 = arith.constant 0 : i32
    %c0_i32_0 = arith.constant 0 : i32
    %c0_i32_1 = arith.constant 0 : i32
    return %c0_i32, %c0_i32_0 : i32, i32
  }
  func.func @transform_6(%arg0: i32, %arg1: i32, %arg2: i32) -> (i32, i32) {
    %c0_i32 = arith.constant 0 : i32
    %c0_i32_0 = arith.constant 0 : i32
    %c0_i32_1 = arith.constant 0 : i32
    return %c0_i32, %c0_i32_0 : i32, i32
  }
  func.func @transform_7(%arg0: i32, %arg1: i32, %arg2: i32) -> (i32, i32, i32) {
    %c0_i32 = arith.constant 0 : i32
    %c0_i32_0 = arith.constant 0 : i32
    return %arg0, %arg1, %c0_i32 : i32, i32, i32
  }
}

</mosaic_0001>

<bundles_post_ra>
// kernel: tpu_custom_call.1
= control target key start
LH: loop header
LB: loop body
LE: loop exit
PB: predicated region body
PF: predicated region fallthrough
CT: control target
= control target key end

     0   :  { %s3622_s0 = inlined_call_operand.hbm [shape: f32[2,128,128], index: 0, kind: input, shape index: {}]   ;;  %s3623_s1 = inlined_call_operand.hbm [shape: f32[2,128,128], index: 1, kind: input, shape index: {}]   ;;  %s3624_s2 = inlined_call_operand.vmem [shape: f32[1,128], index: 2, kind: input, shape index: {}]   ;;  %s3625_s3 = inlined_call_operand.hbm [shape: f32[128,128], index: 3, kind: input, shape index: {}]   ;;  %s3626_s4 = inlined_call_operand.vmem [shape: f32[1,128], index: 4, kind: input, shape index: {}]   ;;  %s3627_s5 = inlined_call_operand.hbm [shape: f32[128,128], index: 5, kind: input, shape index: {}]   ;;  %s3628_s6 = inlined_call_operand.vmem [shape: f32[1,128], index: 6, kind: input, shape index: {}]   ;;  %s3629_s7 = inlined_call_operand.hbm [shape: f32[2,128,128], index: 7, kind: output, shape index: {}]  }
   0x1   :  { %3636 = sst [smem:[#allocation22_spill]] %s3622_s0 }
   0x2   :  { %3637 = sst [smem:[#allocation23_spill]] %s3623_s1 }
   0x3   :  { %3638 = sst [smem:[#allocation24_spill]] %s3625_s3 }
   0x4   :  { %3639 = sst [smem:[#allocation25_spill]] %s3627_s5 }
   0x5   :  { %12 = vsyncpa [#allocation7], 0 }
   0x6   :  { %14 = vsyncpa [#allocation7 + $0x1], 0 }
   0x7   :  { %15 = vsyncpa [#allocation10], 0 }
   0x8   :  { %17 = vsyncpa [#allocation10 + $0x1], 0 }
   0x9   :  { %18 = vsyncpa [#allocation13], 0 }
   0xa   :  { %19 = vsyncpa [#allocation8], 0 }
   0xb   :  { %21 = vsyncpa [#allocation8 + $0x1], 0  ;;  %s2878_s24 = smov 0   ;;  %s2880_s25 = smov 0  }
   0xc   :  { %s2882_s26 = smov 0   ;;  %s2884_s27 = smov 0  }
   0xd   :  { %s2886_s28 = smov 0   ;;  %s2888_s29 = smov 0  }
   0xe LB: > { %3640 = sst [smem:[#allocation20_spill]] %s2820_s28  ;;  %s2909_s30 = sadd.s32 4294967295, %s2824_s29   ;;  %s2824_s29 = sphi %s2888_s29, %s27_s29   ;;  %s2820_s28 = sphi %s2886_s28, %s3670_s28   ;;  %s2816_s27 = sphi %s2884_s27, %s3669_s27   ;;  %s2812_s26 = sphi %s2882_s26, %s3673_s26   ;;  %s2808_s25 = sphi %s2880_s25, %s3672_s25   ;;  %s2804_s24 = sphi %s2878_s24, %s3671_s24  }
   0xf   : > { %s2018_s8 = sadd.s32 4294967294, %s2824_s29   ;;  %p68_p0 = scmp.ne.s32.totalorder %s2808_s25, %s2804_s24 }
  0x10   : > { %p69_p1 = scmp.eq.s32.totalorder %s2909_s30, 0  ;;  %p232_p2 = scmp.eq.s32.totalorder %s2909_s30, 1 }
  0x11   : > { %p238_p3 = scmp.eq.s32.totalorder %s2018_s8, 1  ;;  %p2019_p5 = scmp.ge.s32.totalorder %s2824_s29, 1 }
  0x12   : > { %p2918_p4 = por %p69_p1, %p68_p0  ;;  %p245_p7 = scmp.lt.s32.totalorder %s2824_s29, 3 }
  0x13   : > { %p2923_p6 = por %p238_p3, %p68_p0  ;;  %s2826_s12 = smov [#allocation11]  }
  0x14   : > { %p2928_p8 = pnand %p2019_p5, %p245_p7  ;;  %s263_s13 = sshll.u32 %s2826_s12, 4  ;;  %s264_s13 = int_to_ptr.vmem [resolvable:$true] %s263_s13 }
  0x15   : > { %s2827_s15 = smov [#allocation12]   ;;  %s2635_s17 = scalar_lea.vmem %s264_s13, 2048 }
  0x16   : > { %p2445_p9 = pneg %p2928_p8  ;;  %s279_s16 = sshll.u32 %s2827_s15, 4  ;;  %s280_s16 = int_to_ptr.vmem [resolvable:$true] %s279_s16 }
  0x17   : > { %p2636_p13 = scmp.ne.s32.totalorder %s264_s13, %s2635_s17  ;;  %p2643_p5 = scmp.lt.s32.totalorder %s264_s13, %s264_s13 }
  0x18   : > { %p2937_p11 = pnand %p2445_p9, %p69_p1  ;;  %p2644_p7 = scmp.lt.s32.totalorder %s2635_s17, %s2635_s17 }
  0x1a   : > { %p2626_p12 = pneg %p2937_p11  ;;  %p2645_p10 = por %p2644_p7, %p2643_p5 }
  0x1c   : > { %p2638_p0 = pnand %p2636_p13, %p2626_p12 }
  0x1e   : > { %p2639_p3 = pneg %p2638_p0 }
  0x20   : > { %p2646_p9 = pnand %p2645_p10, %p2639_p3 }
  0x22   : > { %2649 = shalt.err (!%p2646_p9)
}
  0x23   : > { %s3630_s18 = smov 128   ;;  %s3632_s19 = smov 8  }
  0x24   : > { %s3645_s3 = sld [smem:[#allocation24_spill]]  ;;  %s2661_s22 = scalar_lea.vmem %s280_s16, 2048 }
  0x25   : > { %p2662_p13 = scmp.ne.s32.totalorder %s280_s16, %s2661_s22  ;;  %p2669_p10 = scmp.lt.s32.totalorder %s280_s16, %s280_s16 }
  0x26   : > { %p2670_p3 = scmp.lt.s32.totalorder %s2661_s22, %s2661_s22 }
  0x27   : > { %p2664_p0 = pnand %p2662_p13, %p2626_p12 }
  0x28   : > { %p2671_p7 = por %p2670_p3, %p2669_p10 }
  0x29   : > { %p2665_p5 = pneg %p2664_p0 }
  0x2a   : > { %2448 = dma.hbm_to_vmem [thread:$0]  (!%p2937_p11), %s3645_s3, 2048, %s264_s13, [#allocation10], %s3630_s18, %s3630_s18, %s3632_s19  }
  0x2b   : > { %p2672_p9 = pnand %p2671_p7, %p2665_p5 }
  0x2d   : > { %2675 = shalt.err (!%p2672_p9)
}
  0x2e   : > { %s3646_s5 = sld [smem:[#allocation25_spill]]  ;;  %s46_s12 = sadd.s32 1, %s2820_s28 }
  0x2f   : > { %s55_s13 = sadd.s32 1, %s2812_s26  ;;  %p48_p12 = scmp.ge.s32.totalorder %s46_s12, 2 }
  0x30   : > { %p62_p13 = scmp.ne.s32.totalorder %s2812_s26, %s2808_s25  ;;  %p63_p0 = scmp.eq.s32.totalorder %s2824_s29, 0 }
  0x31   : > { %p2465_p5 = scmp.lt.s32.totalorder %s2824_s29, 2  ;;  %s3675_s12 = smov (%p48_p12, %s46_s12), 0 }
  0x32   : > { %3647 = sst [smem:[#allocation21_spill]] %s3675_s12  ;;  %p64_p10 = por %p63_p0, %p62_p13 }
  0x33   : > { %p2975_p3 = por %p232_p2, %p62_p13  ;;  %s50_s15 = ssub.s32 %s2820_s28, %s3675_s12 }
  0x34   : > { %2451 = dma.hbm_to_vmem [thread:$0]  (!%p2937_p11), %s3646_s5, 2048, %s280_s16, [#allocation13], %s3630_s18, %s3630_s18, %s3632_s19  }
  0x35   : > { %s296_s17 = sand.u32 1, %s2812_s26   ;;  %p53_p7 = scmp.eq.s32.totalorder %s50_s15, 0 }
  0x36   : > { %s2982_s16 = sshll.u32 %s296_s17, 7  ;;  %s2044_s20 = sshll.u32 %s2820_s28, 11 }
  0x37   : > { %s2986_s21 = scalar_select %p53_p7, %s2812_s26, %s55_s13  }
  0x38   : > { %s3649_s0 = sld [smem:[#allocation22_spill]]  ;;  %s300_s18 = scalar_lea.vmem [#allocation6], %s2982_s16 }
  0x39   : > { %s309_s19 = sshll.u32 %s300_s18, 4  ;;  %p2994_p2 = pnand %p2465_p5, %p64_p10  ;;  %s310_s19 = int_to_ptr.vmem [resolvable:$true] %s309_s19 }
  0x3a   : > { %s3651_s1 = sld [smem:[#allocation23_spill]]  ;;  %s297_s13 = scalar_lea.sflag [#allocation7], %s296_s17 }
  0x3b   : > { %p2678_p11 = pneg %p2994_p2  ;;  %s2689_s22 = scalar_lea.vmem %s310_s19, 2048 }
  0x3c   : > { %p2690_p9 = scmp.ne.s32.totalorder %s310_s19, %s2689_s22  ;;  %s2830_s18 = smov [#allocation6]  }
  0x3d   : > { %s2694_s23 = sshll.u32 %s2830_s18, 4  ;;  %s2695_s23 = int_to_ptr.vmem [resolvable:$false] %s2694_s23 }
  0x3e   : > { %s308_s8 = scalar_lea.hbm %s3649_s0, %s2044_s20  ;;  %p2692_p12 = pnand %p2690_p9, %p2678_p11 }
  0x3f   : > { %s2696_s0 = scalar_lea.vmem %s2695_s23, 4096  ;;  %p2697_p0 = scmp.lt.s32.totalorder %s310_s19, %s2695_s23 }
  0x40   : > { %s3001_s12 = scalar_lea.hbm %s3651_s1, %s2044_s20  ;;  %p2693_p13 = pneg %p2692_p12 }
  0x41   : > { %p2698_p5 = scmp.lt.s32.totalorder %s2696_s0, %s2689_s22 }
  0x43   : > { %p2699_p10 = por %p2698_p5, %p2697_p0 }
  0x45   : > { %p2700_p7 = pnand %p2699_p10, %p2693_p13 }
  0x47   : > { %2703 = shalt.err (!%p2700_p7)
}
  0x48   : > { %s3652_s5 = smov 8   ;;  %s3653_s17 = smov 128  }
  0x49   : > { %2455 = dma.hbm_to_vmem [thread:$0]  (!%p2994_p2), %s308_s8, 2048, %s310_s19, %s297_s13, %s3653_s17, %s3653_s17, %s3652_s5  }
  0x4a   : > { %s323_s20 = scalar_lea.vmem [#allocation9], %s2982_s16  ;;  %s319_s1 = sand.u32 1, %s2824_s29  }
  0x4b   : > { %s332_s15 = sshll.u32 %s323_s20, 4  ;;  %s320_s18 = scalar_lea.sflag [#allocation10], %s319_s1  ;;  %s333_s15 = int_to_ptr.vmem [resolvable:$true] %s332_s15 }
  0x4c   : > { %s2717_s28 = scalar_lea.vmem %s333_s15, 2048  ;;  %s2831_s0 = smov [#allocation9]  }
  0x4d   : > { %p2718_p9 = scmp.ne.s32.totalorder %s333_s15, %s2717_s28  ;;  %s2722_s22 = sshll.u32 %s2831_s0, 4  ;;  %s2723_s22 = int_to_ptr.vmem [resolvable:$false] %s2722_s22 }
  0x4e   : > { %s2724_s23 = scalar_lea.vmem %s2723_s22, 4096  ;;  %p2725_p0 = scmp.lt.s32.totalorder %s333_s15, %s2723_s22 }
  0x4f   : > { %p2720_p12 = pnand %p2718_p9, %p2678_p11  ;;  %p2726_p5 = scmp.lt.s32.totalorder %s2724_s23, %s2717_s28 }
  0x51   : > { %p2721_p13 = pneg %p2720_p12  ;;  %p2727_p10 = por %p2726_p5, %p2725_p0 }
  0x53   : > { %p2728_p7 = pnand %p2727_p10, %p2721_p13 }
  0x55   : > { %2731 = shalt.err (!%p2728_p7)
}
  0x56   : > { %2458 = dma.hbm_to_vmem [thread:$0]  (!%p2994_p2), %s3001_s12, 2048, %s333_s15, %s320_s18, %s3653_s17, %s3653_s17, %s3652_s5  }
  0x57   : > { %344 = sbr.rel (%p2928_p8) target bundleno = 1368 (0x558), region = 48  ;;  %s3027_s1 = sand.u32 (!%p2928_p8), 1, %s2808_s25  }
  0x58   : > { %s3030_s28 = sshll.u32 (!%p2928_p8), %s3027_s1, 7  ;;  %s347_s19 = scalar_lea.sflag (!%p2928_p8), [#allocation7], %s3027_s1 }
  0x59   : > { %s3034_s16 = scalar_lea.vmem (!%p2928_p8), [#allocation6], %s3030_s28 }
  0x5c   : > { %2783 = dma.done.wait (%p2918_p4), %s347_s19, 2048  }
  0x5d   : > { %2785 = vsyncadd (%p2918_p4), %s347_s19, 4294965248  ;;  %s355_s3 = sand.u32 1, %s2909_s30   ;;  %s3042_s12 = scalar_lea.vmem [#allocation9], %s3030_s28 }
  0x5e   : > { %s356_s11 = scalar_lea.sflag [#allocation10], %s355_s3 }
  0x5f   : > { %2787 = dma.done.wait (%p2918_p4), %s356_s11, 2048  }
  0x60   : > { %2789 = vsyncadd (%p2918_p4), %s356_s11, 4294965248 }
  0x61   : > { %2791 = dma.done.wait (%p69_p1), [#allocation10], 2048  }
  0x62   : > { %2793 = vsyncadd (%p69_p1), [#allocation10], 4294965248 }
  0x63   : > { %2795 = dma.done.wait (%p69_p1), [#allocation13], 2048  }
  0x64   : > { %2797 = vsyncadd (%p69_p1), [#allocation13], 4294965248  ;;  %v447_v0 = vld [vmem:[#allocation11 + $0x78] sm:$0xff]  ;;  %v446_v1 = vld [vmem:[#allocation11 + $0x70] sm:$0xff]  ;;  %vm616_vm0 = vcmask 7168   ;;  %s3521_s20 = scalar_lea.vmem [#allocation14], %s3030_s28 }
  0x65   : > { %2175 = vmatprep.subr.mxu0 %v447_v0  ;;  %v445_v2 = vld [vmem:[#allocation11 + $0x68] sm:$0xff]  ;;  %v444_v3 = vld [vmem:[#allocation11 + $0x60] sm:$0xff]  ;;  %v443_v5 = vld [vmem:[#allocation11 + $0x58] sm:$0xff]  ;;  %s2046_s15 = sshll.u32 %s2816_s27, 11  ;;  %s1870_s18 = sshll.u32 %s3521_s20, 4  ;;  %s3572_s18 = int_to_ptr.vmem [resolvable:$true] %s1870_s18 }
  0x66   : > { %2176 = vmatpush3.msra.mxu0 %v447_v0  ;;  %v416_v4 = vld [vmem:[%s3034_s16] sm:$0xff]  ;;  %v442_v6 = vld [vmem:[#allocation11 + $0x50] sm:$0xff]  ;;  %v441_v7 = vld [vmem:[#allocation11 + $0x48] sm:$0xff]  ;;  %s3570_s23 = scalar_lea.hbm %s3629_s7, %s2046_s15  ;;  %s1855_s27 = scalar_lea.sflag [#allocation8], %s3027_s1 }
  0x67   : > { %2177 = vmatprep.subr.mxu0 %v446_v1  ;;  %2207 = vmatprep.mubr.f32.mxu0 %v416_v4  ;;  %v680_v8 = vld [vmem:[%s3042_s12 + $0x78] sm:$0xff]  ;;  %v3059_v9 = vld [vmem:[%s3042_s12 + $0x70] sm:$0xff]  ;;  %v440_v10 = vld [vmem:[#allocation11 + $0x40] sm:$0xff]  ;;  %s2732_s28 = scalar_lea.vmem %s3572_s18, 2048  ;;  %s2835_s19 = smov [#allocation14]  }
  0x68   : > { %2178 = vmatpush3.msra.mxu0 %v446_v1  ;;  %2231 = vmatprep.subr.mxu1 %v680_v8  ;;  %v439_v11 = vld [vmem:[#allocation11 + $0x38] sm:$0xff]  ;;  %v678_v12 = vld [vmem:[%s3042_s12 + $0x68] sm:$0xff]  ;;  %v438_v13 = vld [vmem:[#allocation11 + $0x30] sm:$0xff]  ;;  %p2733_p1 = scmp.ne.s32.totalorder %s3572_s18, %s2732_s28 }
  0x69   : > { %2179 = vmatprep.subr.mxu0 %v445_v2  ;;  %2232 = vmatpush3.xpose.msra.mxu1 %v680_v8  ;;  %v437_v14 = vld [vmem:[#allocation11 + $0x28] sm:$0xff]  ;;  %v677_v15 = vld [vmem:[%s3042_s12 + $0x60] sm:$0xff]  ;;  %v435_v17 = vld [vmem:[#allocation11 + $0x18] sm:$0xff] }
  0x6a   : > { %2180 = vmatpush3.msra.mxu0 %v445_v2  ;;  %2233 = vmatprep.subr.mxu1 %v3059_v9  ;;  %v436_v16 = vld [vmem:[#allocation11 + $0x20] sm:$0xff]  ;;  %v676_v18 = vld [vmem:[%s3042_s12 + $0x58] sm:$0xff]  ;;  %v434_v19 = vld [vmem:[#allocation11 + $0x10] sm:$0xff]  ;;  %p2734_p4 = pnand %p2733_p1, %p2975_p3 }
  0x6b   : > { %2181 = vmatprep.subr.mxu0 %v444_v3  ;;  %v433_v20 = vld [vmem:[#allocation11 + $0x8] sm:$0xff]  ;;  %v675_v21 = vld [vmem:[%s3042_s12 + $0x50] sm:$0xff]  ;;  %v432_v22 = vld [vmem:[#allocation11] sm:$0xff] }
  0x6c   : > { %2182 = vmatpush3.msra.mxu0 %v444_v3  ;;  %v417_v23 = vld [vmem:[%s3034_s16 + $0x8] sm:$0xff]  ;;  %v418_v25 = vld [vmem:[%s3034_s16 + $0x10] sm:$0xff]  ;;  %v419_v26 = vld [vmem:[%s3034_s16 + $0x18] sm:$0xff]  ;;  %p2735_p8 = pneg %p2734_p4 }
  0x6d   : > { %2183 = vmatprep.subr.mxu0 %v443_v5  ;;  %2234 = vmatpush3.xpose.msra.mxu1 %v3059_v9  ;;  %v674_v24 = vld [vmem:[%s3042_s12 + $0x48] sm:$0xff]  ;;  %v673_v27 = vld [vmem:[%s3042_s12 + $0x40] sm:$0xff]  ;;  %v672_v30 = vld [vmem:[%s3042_s12 + $0x38] sm:$0xff] }
  0x6e   : > { %2184 = vmatpush3.msra.mxu0 %v443_v5  ;;  %2235 = vmatprep.subr.mxu1 %v678_v12  ;;  %v420_v28 = vld [vmem:[%s3034_s16 + $0x20] sm:$0xff]  ;;  %v421_v29 = vld [vmem:[%s3034_s16 + $0x28] sm:$0xff]  ;;  %v422_v31 = vld [vmem:[%s3034_s16 + $0x30] sm:$0xff] }
  0x6f   : > { %2185 = vmatprep.subr.mxu0 %v442_v6  ;;  %v423_v32 = vld [vmem:[%s3034_s16 + $0x38] sm:$0xff]  ;;  %v671_v33 = vld [vmem:[%s3042_s12 + $0x30] sm:$0xff]  ;;  %v424_v34 = vld [vmem:[%s3034_s16 + $0x40] sm:$0xff] }
  0x70   : > { %2186 = vmatpush3.msra.mxu0 %v442_v6  ;;  %v425_v35 = vld [vmem:[%s3034_s16 + $0x48] sm:$0xff]  ;;  %v426_v37 = vld [vmem:[%s3034_s16 + $0x50] sm:$0xff]  ;;  %v427_v38 = vld [vmem:[%s3034_s16 + $0x58] sm:$0xff] }
  0x71   : > { %2187 = vmatprep.subr.mxu0 %v441_v7  ;;  %2236 = vmatpush3.xpose.msra.mxu1 %v678_v12  ;;  %v670_v36 = vld [vmem:[%s3042_s12 + $0x28] sm:$0xff]  ;;  %v669_v39 = vld [vmem:[%s3042_s12 + $0x20] sm:$0xff]  ;;  %v668_v42 = vld [vmem:[%s3042_s12 + $0x18] sm:$0xff] }
  0x72   : > { %2188 = vmatpush3.msra.mxu0 %v441_v7  ;;  %2237 = vmatprep.subr.mxu1 %v677_v15  ;;  %v428_v40 = vld [vmem:[%s3034_s16 + $0x60] sm:$0xff]  ;;  %v429_v41 = vld [vmem:[%s3034_s16 + $0x68] sm:$0xff]  ;;  %v430_v43 = vld [vmem:[%s3034_s16 + $0x70] sm:$0xff] }
  0x73   : > { %2189 = vmatprep.subr.mxu0 %v440_v10  ;;  %v431_v44 = vld [vmem:[%s3034_s16 + $0x78] sm:$0xff]  ;;  %v667_v45 = vld [vmem:[%s3042_s12 + $0x10] sm:$0xff]  ;;  %v666_v46 = vld [vmem:[%s3042_s12 + $0x8] sm:$0xff] }
  0x74   : > { %2190 = vmatpush3.msra.mxu0 %v440_v10  ;;  %v665_v47 = vld [vmem:[%s3042_s12] sm:$0xff] }
  0x75   : > { %2191 = vmatprep.subr.mxu0 %v439_v11  ;;  %2238 = vmatpush3.xpose.msra.mxu1 %v677_v15  ;;  %v2036_v49 = vld [vmem:[%s3626_s4] ss:$0 sm:$0xff] }
  0x76   : > { %2192 = vmatpush3.msra.mxu0 %v439_v11  ;;  %2239 = vmatprep.subr.mxu1 %v676_v18 }
  0x77   : > { %2193 = vmatprep.subr.mxu0 %v438_v13 }
  0x78   : > { %2194 = vmatpush3.msra.mxu0 %v438_v13 }
  0x79   : > { %2195 = vmatprep.subr.mxu0 %v437_v14  ;;  %2240 = vmatpush3.xpose.msra.mxu1 %v676_v18 }
  0x7a   : > { %2196 = vmatpush3.msra.mxu0 %v437_v14  ;;  %2241 = vmatprep.subr.mxu1 %v675_v21 }
  0x7b   : > { %2197 = vmatprep.subr.mxu0 %v436_v16 }
  0x7c   : > { %2198 = vmatpush3.msra.mxu0 %v436_v16 }
  0x7d   : > { %2199 = vmatprep.subr.mxu0 %v435_v17  ;;  %2242 = vmatpush3.xpose.msra.mxu1 %v675_v21 }
  0x7e   : > { %2200 = vmatpush3.msra.mxu0 %v435_v17  ;;  %2243 = vmatprep.subr.mxu1 %v674_v24  ;;  %v2832_v17 = vmov -inf  }
  0x7f   : > { %2201 = vmatprep.subr.mxu0 %v434_v19  ;;  %617 = vst.msk [vmem:[#allocation3] sm:$0xff] %vm616_vm0, %v2832_v17  ;;  %618 = vst.msk [vmem:[#allocation3 + $0x8] sm:$0xff] %vm616_vm0, %v2832_v17 }
  0x80   : > { %2202 = vmatpush3.msra.mxu0 %v434_v19  ;;  %619 = vst.msk [vmem:[#allocation3 + $0x10] sm:$0xff] %vm616_vm0, %v2832_v17  ;;  %620 = vst.msk [vmem:[#allocation3 + $0x18] sm:$0xff] %vm616_vm0, %v2832_v17  ;;  %v3116_v19 = vld [vmem:[%s3624_s2] ss:$0 sm:$0xff] }
  0x81   : > { %2203 = vmatprep.subr.mxu0 %v433_v20  ;;  %2244 = vmatpush3.xpose.msra.mxu1 %v674_v24  ;;  %621 = vst.msk [vmem:[#allocation3 + $0x20] sm:$0xff] %vm616_vm0, %v2832_v17  ;;  %622 = vst.msk [vmem:[#allocation3 + $0x28] sm:$0xff] %vm616_vm0, %v2832_v17 }
  0x82   : > { %2204 = vmatpush3.msra.mxu0 %v433_v20  ;;  %2245 = vmatprep.subr.mxu1 %v673_v27  ;;  %623 = vst.msk [vmem:[#allocation3 + $0x30] sm:$0xff] %vm616_vm0, %v2832_v17  ;;  %624 = vst.msk [vmem:[#allocation3 + $0x38] sm:$0xff] %vm616_vm0, %v2832_v17 }
  0x83   : > { %2205 = vmatprep.subr.mxu0 %v432_v22  ;;  %625 = vst.msk [vmem:[#allocation3 + $0x40] sm:$0xff] %vm616_vm0, %v2832_v17  ;;  %626 = vst.msk [vmem:[#allocation3 + $0x48] sm:$0xff] %vm616_vm0, %v2832_v17 }
  0x84   : > { %2206 = vmatpush3.msra.mxu0 %v432_v22  ;;  %627 = vst.msk [vmem:[#allocation3 + $0x50] sm:$0xff] %vm616_vm0, %v2832_v17  ;;  %628 = vst.msk [vmem:[#allocation3 + $0x58] sm:$0xff] %vm616_vm0, %v2832_v17 }
  0x85   : > { %2208 = vmatmul.mubr.f32.vlgmr.msra.gmra.mxu0 %v417_v23  ;;  %2287 = vmatprep.subr.mxu0 %v680_v8  ;;  %629 = vst.msk [vmem:[#allocation3 + $0x60] sm:$0xff] %vm616_vm0, %v2832_v17  ;;  %630 = vst.msk [vmem:[#allocation3 + $0x68] sm:$0xff] %vm616_vm0, %v2832_v17 }
  0x86   : > { %2210 = vmatprep.mubr.f32.mxu0 %v418_v25  ;;  %2288 = vmatpush3.msra.mxu0 %v680_v8  ;;  %631 = vst.msk [vmem:[#allocation3 + $0x70] sm:$0xff] %vm616_vm0, %v2832_v17  ;;  %632 = vst.msk [vmem:[#allocation3 + $0x78] sm:$0xff] %vm616_vm0, %v2832_v17 }
  0x87   : > { %2289 = vmatprep.subr.mxu0 %v3059_v9  ;;  %2246 = vmatpush3.xpose.msra.mxu1 %v673_v27 }
  0x88   : > { %2290 = vmatpush3.msra.mxu0 %v3059_v9  ;;  %2247 = vmatprep.subr.mxu1 %v672_v30 }
  0x89   : > { %2211 = vmatmul.mubr.f32.gmra.mxu0 %v419_v26  ;;  %2291 = vmatprep.subr.mxu0 %v678_v12 }
  0x8a   : > { %2213 = vmatprep.mubr.f32.mxu0 %v420_v28  ;;  %2292 = vmatpush3.msra.mxu0 %v678_v12 }
  0x8b   : > { %2293 = vmatprep.subr.mxu0 %v677_v15  ;;  %2248 = vmatpush3.xpose.msra.mxu1 %v672_v30 }
  0x8c   : > { %2294 = vmatpush3.msra.mxu0 %v677_v15  ;;  %2249 = vmatprep.subr.mxu1 %v671_v33 }
  0x8d   : > { %2214 = vmatmul.mubr.f32.gmra.mxu0 %v421_v29  ;;  %2295 = vmatprep.subr.mxu0 %v676_v18 }
  0x8e   : > { %2216 = vmatprep.mubr.f32.mxu0 %v422_v31  ;;  %2296 = vmatpush3.msra.mxu0 %v676_v18 }
  0x8f   : > { %2297 = vmatprep.subr.mxu0 %v675_v21  ;;  %2250 = vmatpush3.xpose.msra.mxu1 %v671_v33 }
  0x90   : > { %2298 = vmatpush3.msra.mxu0 %v675_v21  ;;  %2251 = vmatprep.subr.mxu1 %v670_v36 }
  0x91   : > { %2217 = vmatmul.mubr.f32.gmra.mxu0 %v423_v32  ;;  %2299 = vmatprep.subr.mxu0 %v674_v24 }
  0x92   : > { %2219 = vmatprep.mubr.f32.mxu0 %v424_v34  ;;  %2300 = vmatpush3.msra.mxu0 %v674_v24 }
  0x93   : > { %2252 = vmatpush3.xpose.msra.mxu1 %v670_v36  ;;  %2301 = vmatprep.subr.mxu0 %v673_v27 }
  0x94   : > { %2253 = vmatprep.subr.mxu1 %v669_v39  ;;  %2302 = vmatpush3.msra.mxu0 %v673_v27 }
  0x95   : > { %2220 = vmatmul.mubr.f32.gmra.mxu0 %v425_v35  ;;  %2303 = vmatprep.subr.mxu0 %v672_v30 }
  0x96   : > { %2222 = vmatprep.mubr.f32.mxu0 %v426_v37  ;;  %2304 = vmatpush3.msra.mxu0 %v672_v30 }
  0x97   : > { %2254 = vmatpush3.xpose.msra.mxu1 %v669_v39  ;;  %2305 = vmatprep.subr.mxu0 %v671_v33 }
  0x98   : > { %2255 = vmatprep.subr.mxu1 %v668_v42  ;;  %2306 = vmatpush3.msra.mxu0 %v671_v33 }
  0x99   : > { %2223 = vmatmul.mubr.f32.gmra.mxu0 %v427_v38  ;;  %2307 = vmatprep.subr.mxu0 %v670_v36 }
  0x9a   : > { %2225 = vmatprep.mubr.f32.mxu0 %v428_v40  ;;  %2308 = vmatpush3.msra.mxu0 %v670_v36  ;;  %v2833_v36 = vmov 0  }
  0x9b   : > { %2256 = vmatpush3.xpose.msra.mxu1 %v668_v42  ;;  %2309 = vmatprep.subr.mxu0 %v669_v39 }
  0x9c   : > { %2257 = vmatprep.subr.mxu1 %v667_v45  ;;  %2310 = vmatpush3.msra.mxu0 %v669_v39 }
  0x9d   : > { %2226 = vmatmul.mubr.f32.gmra.mxu0 %v429_v41  ;;  %2311 = vmatprep.subr.mxu0 %v668_v42 }
  0x9e   : > { %2228 = vmatprep.mubr.f32.mxu0 %v430_v43  ;;  %2312 = vmatpush3.msra.mxu0 %v668_v42 }
  0x9f   : > { %2258 = vmatpush3.xpose.msra.mxu1 %v667_v45  ;;  %2313 = vmatprep.subr.mxu0 %v667_v45 }
  0xa0   : > { %2259 = vmatprep.subr.mxu1 %v666_v46  ;;  %2314 = vmatpush3.msra.mxu0 %v667_v45 }
  0xa1   : > { %2229 = vmatmul.mubr.f32.gmra.mxu0 %v431_v44  ;;  %2315 = vmatprep.subr.mxu0 %v666_v46 }
  0xa2   : > { %2316 = vmatpush3.msra.mxu0 %v666_v46  ;;  %2526 = vset.pattern.permute.xlu0 %v2833_v36 }
  0xa3   : > { %2260 = vmatpush3.xpose.msra.mxu1 %v666_v46  ;;  %2317 = vmatprep.subr.mxu0 %v665_v47 }
  0xa4   : > { %2261 = vmatprep.subr.mxu1 %v665_v47  ;;  %2318 = vmatpush3.msra.mxu0 %v665_v47 }
  0xa5   : > { %2527 = vset.pattern.permute.xlu1 %v2833_v36 }
  0xa7   : > { %2262 = vmatpush3.xpose.msra.mxu1 %v665_v47 }
 0x145   : > { %v2209_v48 = vpop.f32.mrf.mxu0 }
 0x146   : > { %v527_v52 = vadd.f32 %v2209_v48, %v2036_v49 }
 0x147   : > { %v521_v50 = vpop.f32.mrf.mxu0 }
 0x148   : > { %v522_v51 = vadd.f32 %v2036_v49, %v521_v50 }
 0x149   : > { %v2212_v53 = vpop.f32.mrf.mxu0 }
 0x14a   : > { %2263 = vmatprep.mubr.f32.mxu1 %v522_v51  ;;  %v537_v54 = vadd.f32 %v2212_v53, %v2036_v49  ;;  %v3198_v53 = vld [vmem:[#allocation3] sm:$0xff] }
 0x14b   : > { %v531_v55 = vpop.f32.mrf.mxu0  ;;  %2264 = vmatmul.mubr.f32.vlgmr.msra.gmra.mxu1 %v527_v52 }
 0x14c   : > { %v532_v56 = vadd.f32 %v2036_v49, %v531_v55  ;;  %v3200_v55 = vld [vmem:[#allocation3 + $0x18] sm:$0xff] }
 0x14d   : > { %v2215_v57 = vpop.f32.mrf.mxu0 }
 0x14e   : > { %2266 = vmatprep.mubr.f32.mxu1 %v532_v56  ;;  %v547_v58 = vadd.f32 %v2215_v57, %v2036_v49 }
 0x14f   : > { %2267 = vmatmul.mubr.f32.gmra.mxu1 %v537_v54  ;;  %v541_v59 = vpop.f32.mrf.mxu0 }
 0x150   : > { %v542_v60 = vadd.f32 %v2036_v49, %v541_v59 }
 0x151   : > { %v2218_v61 = vpop.f32.mrf.mxu0 }
 0x152   : > { %2269 = vmatprep.mubr.f32.mxu1 %v542_v60  ;;  %v557_v62 = vadd.f32 %v2218_v61, %v2036_v49 }
 0x153   : > { %v551_v63 = vpop.f32.mrf.mxu0  ;;  %2270 = vmatmul.mubr.f32.gmra.mxu1 %v547_v58  ;;  %v3205_v58 = vld [vmem:[#allocation3 + $0x8] sm:$0xff] }
 0x154   : > { %v552_v0 = vadd.f32 %v2036_v49, %v551_v63 }
 0x155   : > { %v2221_v1 = vpop.f32.mrf.mxu0 }
 0x156   : > { %2272 = vmatprep.mubr.f32.mxu1 %v552_v0  ;;  %v567_v2 = vadd.f32 %v2221_v1, %v2036_v49 }
 0x157   : > { %v561_v3 = vpop.f32.mrf.mxu0  ;;  %2273 = vmatmul.mubr.f32.gmra.mxu1 %v557_v62  ;;  %v3215_v62 = vld [vmem:[#allocation3 + $0x10] sm:$0xff] }
 0x158   : > { %v562_v4 = vadd.f32 %v2036_v49, %v561_v3 }
 0x159   : > { %v2224_v5 = vpop.f32.mrf.mxu0 }
 0x15a   : > { %2275 = vmatprep.mubr.f32.mxu1 %v562_v4  ;;  %v577_v6 = vadd.f32 %v2224_v5, %v2036_v49  ;;  %v3234_v5 = vld [vmem:[#allocation3 + $0x28] sm:$0xff] }
 0x15b   : > { %v571_v7 = vpop.f32.mrf.mxu0  ;;  %2276 = vmatmul.mubr.f32.gmra.mxu1 %v567_v2  ;;  %v3224_v2 = vld [vmem:[#allocation3 + $0x20] sm:$0xff] }
 0x15c   : > { %v572_v8 = vadd.f32 %v2036_v49, %v571_v7 }
 0x15d   : > { %v2227_v9 = vpop.f32.mrf.mxu0 }
 0x15e   : > { %2278 = vmatprep.mubr.f32.mxu1 %v572_v8  ;;  %v587_v10 = vadd.f32 %v2227_v9, %v2036_v49 }
 0x15f   : > { %v581_v11 = vpop.f32.mrf.mxu0  ;;  %2279 = vmatmul.mubr.f32.gmra.mxu1 %v577_v6 }
 0x160   : > { %v582_v12 = vadd.f32 %v2036_v49, %v581_v11 }
 0x161   : > { %v2230_v13 = vpop.f32.mrf.mxu0 }
 0x162   : > { %2281 = vmatprep.mubr.f32.mxu1 %v582_v12  ;;  %v597_v14 = vadd.f32 %v2230_v13, %v2036_v49  ;;  %v3253_v13 = vld [vmem:[#allocation3 + $0x38] sm:$0xff] }
 0x163   : > { %v591_v15 = vpop.f32.mrf.mxu0  ;;  %2282 = vmatmul.mubr.f32.gmra.mxu1 %v587_v10  ;;  %v3243_v10 = vld [vmem:[#allocation3 + $0x30] sm:$0xff] }
 0x164   : > { %v592_v16 = vadd.f32 %v2036_v49, %v591_v15  ;;  %v2834_v49 = vmov 0.0  }
 0x165   : > { %633 = vst.msk [vmem:[#allocation4] sm:$0xff] %vm616_vm0, %v2834_v49  ;;  %634 = vst.msk [vmem:[#allocation4 + $0x8] sm:$0xff] %vm616_vm0, %v2834_v49 }
 0x166   : > { %2284 = vmatprep.mubr.f32.mxu1 %v592_v16  ;;  %635 = vst.msk [vmem:[#allocation4 + $0x10] sm:$0xff] %vm616_vm0, %v2834_v49  ;;  %636 = vst.msk [vmem:[#allocation4 + $0x18] sm:$0xff] %vm616_vm0, %v2834_v49 }
 0x167   : > { %2285 = vmatmul.mubr.f32.gmra.mxu1 %v597_v14  ;;  %637 = vst.msk [vmem:[#allocation4 + $0x20] sm:$0xff] %vm616_vm0, %v2834_v49  ;;  %638 = vst.msk [vmem:[#allocation4 + $0x28] sm:$0xff] %vm616_vm0, %v2834_v49 }
 0x168   : > { %639 = vst.msk [vmem:[#allocation4 + $0x30] sm:$0xff] %vm616_vm0, %v2834_v49  ;;  %640 = vst.msk [vmem:[#allocation4 + $0x38] sm:$0xff] %vm616_vm0, %v2834_v49 }
 0x169   : > { %641 = vst.msk [vmem:[#allocation4 + $0x40] sm:$0xff] %vm616_vm0, %v2834_v49  ;;  %642 = vst.msk [vmem:[#allocation4 + $0x48] sm:$0xff] %vm616_vm0, %v2834_v49 }
 0x16a   : > { %643 = vst.msk [vmem:[#allocation4 + $0x50] sm:$0xff] %vm616_vm0, %v2834_v49  ;;  %644 = vst.msk [vmem:[#allocation4 + $0x58] sm:$0xff] %vm616_vm0, %v2834_v49 }
 0x16b   : > { %645 = vst.msk [vmem:[#allocation4 + $0x60] sm:$0xff] %vm616_vm0, %v2834_v49  ;;  %646 = vst.msk [vmem:[#allocation4 + $0x68] sm:$0xff] %vm616_vm0, %v2834_v49 }
 0x16c   : > { %647 = vst.msk [vmem:[#allocation4 + $0x70] sm:$0xff] %vm616_vm0, %v2834_v49  ;;  %648 = vst.msk [vmem:[#allocation4 + $0x78] sm:$0xff] %vm616_vm0, %v2834_v49 }
 0x20b   : > { %v2265_v18 = vpop.f32.mrf.mxu1 }
 0x20c   : > { %v3126_v25 = vadd.f32 %v2265_v18, %v3116_v19  ;;  %v3262_v18 = vld [vmem:[#allocation3 + $0x40] sm:$0xff] }
 0x20d   : > { %v770_v20 = vpop.f32.mrf.mxu1 }
 0x20e   : > { %v3119_v21 = vadd.f32 %v3116_v19, %v770_v20 }
 0x20f   : > { %v2268_v22 = vpop.f32.mrf.mxu1 }
 0x210   : > { %v3122_v23 = vadd.f32 %v2268_v22, %v3116_v19  ;;  %865 = vmax.xlane.f32.xlu0 %v3119_v21  ;;  %v3272_v22 = vld [vmem:[#allocation3 + $0x48] sm:$0xff] }
 0x211   : > { %v780_v24 = vpop.f32.mrf.mxu1 }
 0x212   : > { %871 = vmax.xlane.f32.xlu1 %v3122_v23  ;;  %v3130_v26 = vadd.f32 %v3116_v19, %v780_v24 }
 0x213   : > { %v2271_v27 = vpop.f32.mrf.mxu1 }
 0x214   : > { %867 = vmax.xlane.f32.xlu0 %v3126_v25  ;;  %v3135_v29 = vadd.f32 %v2271_v27, %v3116_v19 }
 0x215   : > { %v790_v28 = vpop.f32.mrf.mxu1 }
 0x216   : > { %869 = vmax.xlane.f32.xlu1 %v3130_v26  ;;  %v3138_v30 = vadd.f32 %v3116_v19, %v790_v28 }
 0x217   : > { %v2274_v31 = vpop.f32.mrf.mxu1 }
 0x218   : > { %873 = vmax.xlane.f32.xlu0 %v3138_v30  ;;  %v3143_v33 = vadd.f32 %v2274_v31, %v3116_v19 }
 0x219   : > { %v800_v32 = vpop.f32.mrf.mxu1 }
 0x21a   : > { %875 = vmax.xlane.f32.xlu1 %v3135_v29  ;;  %v3146_v34 = vadd.f32 %v3116_v19, %v800_v32  ;;  %v3281_v32 = vld [vmem:[#allocation3 + $0x50] sm:$0xff] }
 0x21b   : > { %v2277_v35 = vpop.f32.mrf.mxu1 }
 0x21c   : > { %877 = vmax.xlane.f32.xlu0 %v3146_v34  ;;  %v3151_v38 = vadd.f32 %v2277_v35, %v3116_v19 }
 0x21d   : > { %v810_v37 = vpop.f32.mrf.mxu1 }
 0x21e   : > { %879 = vmax.xlane.f32.xlu1 %v3143_v33  ;;  %v3154_v39 = vadd.f32 %v3116_v19, %v810_v37  ;;  %v3291_v37 = vld [vmem:[#allocation3 + $0x58] sm:$0xff] }
 0x21f   : > { %v2280_v40 = vpop.f32.mrf.mxu1 }
 0x220   : > { %881 = vmax.xlane.f32.xlu0 %v3154_v39  ;;  %v3159_v42 = vadd.f32 %v2280_v40, %v3116_v19 }
 0x221   : > { %v820_v41 = vpop.f32.mrf.mxu1 }
 0x222   : > { %883 = vmax.xlane.f32.xlu1 %v3151_v38  ;;  %v3162_v43 = vadd.f32 %v3116_v19, %v820_v41 }
 0x223   : > { %v2283_v44 = vpop.f32.mrf.mxu1 }
 0x224   : > { %885 = vmax.xlane.f32.xlu0 %v3162_v43  ;;  %v3167_v46 = vadd.f32 %v2283_v44, %v3116_v19 }
 0x225   : > { %v830_v45 = vpop.f32.mrf.mxu1 }
 0x226   : > { %887 = vmax.xlane.f32.xlu1 %v3159_v42  ;;  %v3170_v47 = vadd.f32 %v3116_v19, %v830_v45 }
 0x227   : > { %v2286_v48 = vpop.f32.mrf.mxu1 }
 0x228   : > { %889 = vmax.xlane.f32.xlu0 %v3170_v47  ;;  %v3191_v51 = vadd.f32 %v2286_v48, %v3116_v19  ;;  %v3301_v48 = vld [vmem:[#allocation3 + $0x60] sm:$0xff] }
 0x229   : > { %v840_v50 = vpop.f32.mrf.mxu1 }
 0x22a   : > { %891 = vmax.xlane.f32.xlu1 %v3167_v46  ;;  %v3194_v52 = vadd.f32 %v3116_v19, %v840_v50 }
 0x22c   : > { %893 = vmax.xlane.f32.xlu0 %v3194_v52 }
 0x22e   : > { %895 = vmax.xlane.f32.xlu1 %v3191_v51 }
 0x299   : > { %v866_v54 = vpop.xlane.xlu0 %865 }
 0x29a   : > { %v3203_v56 = vmax.f32 %v3198_v53, %v866_v54  ;;  %v3311_v54 = vld [vmem:[#allocation3 + $0x68] sm:$0xff] }
 0x29b   : > { %v872_v57 = vpop.xlane.xlu1 %871 }
 0x29c   : > { %v913_v59 = vsub.f32 %v3198_v53, %v3203_v56  ;;  %1475 = vst.msk [vmem:[#allocation3] sm:$0xff] %vm616_vm0, %v3203_v56  ;;  %v3212_v60 = vmax.f32 %v3200_v55, %v872_v57  ;;  %963 = vperm.xlu0 %2526, %v3203_v56  }
 0x29d   : > { %v868_v61 = vpop.xlane.xlu0 %867 }
 0x29e   : > { %1478 = vst.msk [vmem:[#allocation3 + $0x18] sm:$0xff] %vm616_vm0, %v3212_v60  ;;  %v3222_v0 = vmax.f32 %v3205_v58, %v868_v61 }
 0x29f   : > { %v870_v1 = vpop.xlane.xlu1 %869 }
 0x2a0   : > { %1476 = vst.msk [vmem:[#allocation3 + $0x8] sm:$0xff] %vm616_vm0, %v3222_v0  ;;  %v3231_v4 = vmax.f32 %v3215_v62, %v870_v1  ;;  %968 = vperm.xlu1 %2527, %v3222_v0  }
 0x2a1   : > { %v874_v6 = vpop.xlane.xlu0 %873 }
 0x2a2   : > { %1477 = vst.msk [vmem:[#allocation3 + $0x10] sm:$0xff] %vm616_vm0, %v3231_v4  ;;  %v3241_v8 = vmax.f32 %v3224_v2, %v874_v6  ;;  %v3656_v53 = vsub.f32 %v3215_v62, %v3231_v4 }
 0x2a3   : > { %v876_v9 = vpop.xlane.xlu1 %875 }
 0x2a4   : > { %v3246_v11 = vmax.f32 %v3234_v5, %v876_v9  ;;  %978 = vperm.xlu1 %2527, %v3212_v60   ;;  %1479 = vst.msk [vmem:[#allocation3 + $0x20] sm:$0xff] %vm616_vm0, %v3241_v8  ;;  %v3321_v9 = vld [vmem:[#allocation3 + $0x70] sm:$0xff]  ;;  %v933_v56 = vmul.f32 1.442695, %v3656_v53  ;;  %v3660_v62 = vsub.f32 %v3224_v2, %v3241_v8 }
 0x2a5   : > { %v878_v14 = vpop.xlane.xlu0 %877  ;;  %v1091_v53 = vld [vmem:[#allocation4 + $0x10] sm:$0xff] }
 0x2a6   : > { %1480 = vst.msk [vmem:[#allocation3 + $0x28] sm:$0xff] %vm616_vm0, %v3246_v11  ;;  %v3260_v16 = vmax.f32 %v3243_v10, %v878_v14 }
 0x2a7   : > { %v880_v17 = vpop.xlane.xlu1 %879 }
 0x2a8   : > { %v3265_v19 = vmax.f32 %v3253_v13, %v880_v17  ;;  %973 = vperm.xlu1 %2527, %v3231_v4   ;;  %1481 = vst.msk [vmem:[#allocation3 + $0x30] sm:$0xff] %vm616_vm0, %v3260_v16  ;;  %v937_v4 = vmul.f32 1.442695, %v3660_v62 }
 0x2a9   : > { %v882_v24 = vpop.xlane.xlu0 %881 }
 0x2aa   : > { %1482 = vst.msk [vmem:[#allocation3 + $0x38] sm:$0xff] %vm616_vm0, %v3265_v19  ;;  %v3279_v28 = vmax.f32 %v3262_v18, %v882_v24  ;;  %v3331_v24 = vld [vmem:[#allocation3 + $0x78] sm:$0xff] }
 0x2ab   : > { %v884_v31 = vpop.xlane.xlu1 %883 }
 0x2ac   : > { %v3284_v35 = vmax.f32 %v3272_v22, %v884_v31  ;;  %988 = vperm.xlu1 %2527, %v3246_v11   ;;  %v921_v36 = vsub.f32 %v3262_v18, %v3279_v28  ;;  %1483 = vst.msk [vmem:[#allocation3 + $0x40] sm:$0xff] %vm616_vm0, %v3279_v28 }
 0x2ad   : > { %v886_v40 = vpop.xlane.xlu0 %885 }
 0x2ae   : > { %1484 = vst.msk [vmem:[#allocation3 + $0x48] sm:$0xff] %vm616_vm0, %v3284_v35  ;;  %1008 = vperm.xlu0 %2526, %v3284_v35   ;;  %v3299_v44 = vmax.f32 %v3281_v32, %v886_v40 }
 0x2af   : > { %v888_v45 = vpop.xlane.xlu1 %887 }
 0x2b0   : > { %v3304_v49 = vmax.f32 %v3291_v37, %v888_v45  ;;  %983 = vperm.xlu1 %2527, %v3241_v8   ;;  %1485 = vst.msk [vmem:[#allocation3 + $0x50] sm:$0xff] %vm616_vm0, %v3299_v44 }
 0x2b1   : > { %v890_v57 = vpop.xlane.xlu0 %889 }
 0x2b2   : > { %1486 = vst.msk [vmem:[#allocation3 + $0x58] sm:$0xff] %vm616_vm0, %v3304_v49  ;;  %1018 = vperm.xlu0 %2526, %v3304_v49   ;;  %v3319_v1 = vmax.f32 %v3301_v48, %v890_v57 }
 0x2b3   : > { %v892_v6 = vpop.xlane.xlu1 %891 }
 0x2b4   : > { %v3324_v14 = vmax.f32 %v3311_v54, %v892_v6  ;;  %998 = vperm.xlu1 %2527, %v3265_v19   ;;  %1487 = vst.msk [vmem:[#allocation3 + $0x60] sm:$0xff] %vm616_vm0, %v3319_v1 }
 0x2b5   : > { %v894_v31 = vpop.xlane.xlu0 %893 }
 0x2b6   : > { %1488 = vst.msk [vmem:[#allocation3 + $0x68] sm:$0xff] %vm616_vm0, %v3324_v14  ;;  %1028 = vperm.xlu0 %2526, %v3324_v14   ;;  %v3339_v45 = vmax.f32 %v3321_v9, %v894_v31  ;;  %v3663_v8 = vsub.f32 %v3311_v54, %v3324_v14 }
 0x2b7   : > { %v896_v57 = vpop.xlane.xlu1 %895 }
 0x2b8   : > { %v3342_v6 = vmax.f32 %v3331_v24, %v896_v57  ;;  %993 = vperm.xlu1 %2527, %v3260_v16   ;;  %1489 = vst.msk [vmem:[#allocation3 + $0x70] sm:$0xff] %vm616_vm0, %v3339_v45 }
 0x2ba   : > { %1490 = vst.msk [vmem:[#allocation3 + $0x78] sm:$0xff] %vm616_vm0, %v3342_v6  ;;  %1038 = vperm.xlu0 %2526, %v3342_v6  }
 0x2bc   : > { %1003 = vperm.xlu1 %2527, %v3279_v28   ;;  %v3658_v28 = vsub.f32 %v3200_v55, %v3212_v60  ;;  %v3662_v60 = vsub.f32 %v3234_v5, %v3246_v11 }
 0x2c0   : > { %1013 = vperm.xlu1 %2527, %v3299_v44  }
 0x2c4   : > { %1023 = vperm.xlu1 %2527, %v3319_v1  }
 0x2c8   : > { %1033 = vperm.xlu1 %2527, %v3339_v45  }
 0x317   : > { %v964_v31 = vpop.permute.xlu0 %963 }
 0x318   : > { %v1041_v57 = vsub.f32 %v3119_v21, %v964_v31 }
 0x31a   : > { %v1057_v27 = vmul.f32 1.442695, %v1041_v57 }
 0x31b   : > { %v969_v40 = vpop.permute.xlu1 %968 }
 0x31c   : > { %2528 = vpow2.f32 %v1057_v27  ;;  %v1042_v20 = vsub.f32 %v3126_v25, %v969_v40 }
 0x31e   : > { %v1059_v15 = vmul.f32 1.442695, %v1042_v20 }
 0x31f   : > { %v979_v17 = vpop.permute.xlu1 %978 }
 0x320   : > { %2530 = vpow2.f32 %v1059_v15  ;;  %v1044_v12 = vsub.f32 %v3122_v23, %v979_v17 }
 0x322   : > { %v1063_v61 = vmul.f32 1.442695, %v1044_v12 }
 0x323   : > { %v974_v63 = vpop.permute.xlu1 %973 }
 0x324   : > { %2532 = vpow2.f32 %v1063_v61  ;;  %v1043_v50 = vsub.f32 %v3130_v26, %v974_v63 }
 0x326   : > { %v1061_v7 = vmul.f32 1.442695, %v1043_v50 }
 0x327   : > { %v989_v41 = vpop.permute.xlu1 %988 }
 0x328   : > { %2534 = vpow2.f32 %v1061_v7  ;;  %v1046_v21 = vsub.f32 %v3135_v29, %v989_v41 }
 0x329   : > { %v2529_v3 = vpop.eup %2528  ;;  %v1009_v31 = vpop.permute.xlu0 %1008 }
 0x32a   : > { %v1050_v27 = vsub.f32 %v3151_v38, %v1009_v31  ;;  %1121 = vadd.xlane.f32.xlu1 %v2529_v3  ;;  %2319 = vmatprep.mubr.f32.mxu0 %v2529_v3  ;;  %v1067_v20 = vmul.f32 1.442695, %v1046_v21 }
 0x32b   : > { %v984_v25 = vpop.permute.xlu1 %983 }
 0x32c   : > { %v1075_v15 = vmul.f32 1.442695, %v1050_v27  ;;  %v1045_v23 = vsub.f32 %v3138_v30, %v984_v25 }
 0x32d   : > { %v2531_v12 = vpop.eup %2530  ;;  %v1019_v61 = vpop.permute.xlu0 %1018 }
 0x32e   : > { %2536 = vpow2.f32 %v1075_v15  ;;  %v1065_v26 = vmul.f32 1.442695, %v1045_v23  ;;  %v1052_v63 = vsub.f32 %v3159_v42, %v1019_v61  ;;  %1123 = vadd.xlane.f32.xlu0 %v2531_v12  ;;  %2320 = vmatmul.mubr.f32.vlgmr.msra.gmra.mxu0 %v2531_v12 }
 0x32f   : > { %v999_v7 = vpop.permute.xlu1 %998 }
 0x330   : > { %2538 = vpow2.f32 %v1065_v26  ;;  %v1079_v29 = vmul.f32 1.442695, %v1052_v63  ;;  %v1048_v38 = vsub.f32 %v3143_v33, %v999_v7 }
 0x331   : > { %v2533_v41 = vpop.eup %2532  ;;  %2540 = vpow2.f32 %v1067_v20  ;;  %v1029_v57 = vpop.permute.xlu0 %1028 }
 0x332   : > { %2542 = vpow2.f32 %v1079_v29  ;;  %1127 = vadd.xlane.f32.xlu0 %v2533_v41  ;;  %v1071_v17 = vmul.f32 1.442695, %v1048_v38  ;;  %v1054_v15 = vsub.f32 %v3167_v46, %v1029_v57  ;;  %v945_v57 = vmul.f32 1.442695, %v921_v36 }
 0x333   : > { %v994_v3 = vpop.permute.xlu1 %993 }
 0x334   : > { %v1047_v30 = vsub.f32 %v3146_v34, %v994_v3  ;;  %v1083_v63 = vmul.f32 1.442695, %v1054_v15 }
 0x335   : > { %v2535_v50 = vpop.eup %2534  ;;  %v1039_v12 = vpop.permute.xlu0 %1038 }
 0x336   : > { %v1069_v40 = vmul.f32 1.442695, %v1047_v30  ;;  %1125 = vadd.xlane.f32.xlu0 %v2535_v50  ;;  %2322 = vmatprep.mubr.f32.mxu0 %v2535_v50  ;;  %v1056_v7 = vsub.f32 %v3191_v51, %v1039_v12 }
 0x337   : > { %v1004_v42 = vpop.permute.xlu1 %1003  ;;  %2323 = vmatmul.mubr.f32.gmra.mxu0 %v2533_v41 }
 0x338   : > { %2544 = vpow2.f32 %v1069_v40  ;;  %v1049_v21 = vsub.f32 %v3154_v39, %v1004_v42  ;;  %v1087_v38 = vmul.f32 1.442695, %v1056_v7  ;;  %v929_v42 = vmul.f32 1.442695, %v913_v59  ;;  %v1649_v7 = vld [vmem:[#allocation12 + $0x58] sm:$0xff] }
 0x339   : > { %2546 = vpow2.f32 %v1071_v17  ;;  %v3657_v59 = vsub.f32 %v3281_v32, %v3299_v44  ;;  %v3661_v32 = vsub.f32 %v3301_v48, %v3319_v1  ;;  %v955_v44 = vmul.f32 1.442695, %v3663_v8 }
 0x33a   : > { %v1073_v31 = vmul.f32 1.442695, %v1049_v21  ;;  %v3654_v21 = vsub.f32 %v3205_v58, %v3222_v0  ;;  %v935_v58 = vmul.f32 1.442695, %v3658_v28  ;;  %v3659_v0 = vsub.f32 %v3291_v37, %v3304_v49 }
 0x33b   : > { %v2537_v27 = vpop.eup %2536  ;;  %v1014_v33 = vpop.permute.xlu1 %1013  ;;  %v949_v18 = vmul.f32 1.442695, %v3657_v59  ;;  %v953_v36 = vmul.f32 1.442695, %v3661_v32  ;;  %v939_v37 = vmul.f32 1.442695, %v3662_v60  ;;  %v3664_v49 = vsub.f32 %v3243_v10, %v3260_v16 }
 0x33c   : > { %2548 = vpow2.f32 %v1073_v31  ;;  %v1051_v25 = vsub.f32 %v3162_v43, %v1014_v33  ;;  %1139 = vadd.xlane.f32.xlu1 %v2537_v27  ;;  %v931_v31 = vmul.f32 1.442695, %v3654_v21  ;;  %v3665_v1 = vsub.f32 %v3321_v9, %v3339_v45  ;;  %v1092_v21 = vld [vmem:[#allocation4 + $0x18] sm:$0xff] }
 0x33d   : > { %v2539_v34 = vpop.eup %2538  ;;  %v941_v5 = vmul.f32 1.442695, %v3664_v49  ;;  %v3667_v16 = vsub.f32 %v3331_v24, %v3342_v6  ;;  %v1639_v49 = vld [vmem:[#allocation12 + $0x8] sm:$0xff] }
 0x33e   : > { %v2541_v23 = vpop.eup %2540  ;;  %v1077_v20 = vmul.f32 1.442695, %v1051_v25  ;;  %2325 = vmatprep.mubr.f32.mxu0 %v2539_v34  ;;  %v957_v54 = vmul.f32 1.442695, %v3665_v1  ;;  %v3666_v25 = vsub.f32 %v3253_v13, %v3265_v19  ;;  %v1638_v1 = vld [vmem:[#allocation12] sm:$0xff] }
 0x33f   : > { %v2543_v61 = vpop.eup %2542  ;;  %v1024_v26 = vpop.permute.xlu1 %1023  ;;  %2326 = vmatmul.mubr.f32.gmra.mxu0 %v2541_v23  ;;  %v959_v15 = vmul.f32 1.442695, %v3667_v16 }
 0x340   : > { %2550 = vpow2.f32 %v1077_v20  ;;  %v1053_v39 = vsub.f32 %v3170_v47, %v1024_v26  ;;  %1143 = vadd.xlane.f32.xlu1 %v2543_v61  ;;  %v1652_v26 = vld [vmem:[#allocation12 + $0x70] sm:$0xff] }
 0x342   : > { %v1081_v29 = vmul.f32 1.442695, %v1053_v39  ;;  %v1651_v39 = vld [vmem:[#allocation12 + $0x68] sm:$0xff] }
 0x343   : > { %v1034_v43 = vpop.permute.xlu1 %1033 }
 0x344   : > { %2552 = vpow2.f32 %v1081_v29  ;;  %v1055_v41 = vsub.f32 %v3194_v52, %v1034_v43  ;;  %v1648_v29 = vld [vmem:[#allocation12 + $0x50] sm:$0xff]  ;;  %v1647_v43 = vld [vmem:[#allocation12 + $0x48] sm:$0xff] }
 0x345   : > { %v2545_v46 = vpop.eup %2544  ;;  %2554 = vpow2.f32 %v1083_v63  ;;  %v1650_v63 = vld [vmem:[#allocation12 + $0x60] sm:$0xff] }
 0x346   : > { %v2547_v3 = vpop.eup %2546  ;;  %v1085_v30 = vmul.f32 1.442695, %v1055_v41  ;;  %2328 = vmatprep.mubr.f32.mxu0 %v2545_v46  ;;  %v1646_v41 = vld [vmem:[#allocation12 + $0x40] sm:$0xff] }
 0x347   : > { %2329 = vmatmul.mubr.f32.gmra.mxu0 %v2547_v3 }
 0x348   : > { %2556 = vpow2.f32 %v1085_v30  ;;  %v1642_v30 = vld [vmem:[#allocation12 + $0x20] sm:$0xff] }
 0x349   : > { %v2549_v50 = vpop.eup %2548  ;;  %2558 = vpow2.f32 %v1087_v38  ;;  %v1644_v38 = vld [vmem:[#allocation12 + $0x30] sm:$0xff] }
 0x34a   : > { %1137 = vadd.xlane.f32.xlu0 %v2549_v50  ;;  %2331 = vmatprep.mubr.f32.mxu0 %v2549_v50  ;;  %2560 = vpow2.f32 %v929_v42  ;;  %v1089_v50 = vld [vmem:[#allocation4] sm:$0xff] }
 0x34b   : > { %2332 = vmatmul.mubr.f32.gmra.mxu0 %v2537_v27  ;;  %v3655_v27 = vsub.f32 %v3272_v22, %v3284_v35  ;;  %2562 = vpow2.f32 %v945_v57  ;;  %v951_v22 = vmul.f32 1.442695, %v3659_v0 }
 0x34c   : > { %2564 = vpow2.f32 %v931_v31 }
 0x34d   : > { %v2551_v47 = vpop.eup %2550  ;;  %v947_v33 = vmul.f32 1.442695, %v3655_v27 }
 0x34e   : > { %1129 = vadd.xlane.f32.xlu0 %v2539_v34  ;;  %2334 = vmatprep.mubr.f32.mxu0 %v2551_v47  ;;  %v943_v34 = vmul.f32 1.442695, %v3666_v25 }
 0x34f   : > { %1141 = vadd.xlane.f32.xlu1 %v2551_v47  ;;  %2335 = vmatmul.mubr.f32.gmra.mxu0 %v2543_v61  ;;  %2566 = vpow2.f32 %v947_v33  ;;  %v1653_v61 = vld [vmem:[#allocation12 + $0x78] sm:$0xff] }
 0x350   : > { %2568 = vpow2.f32 %v933_v56  ;;  %2343 = vmatprep.subr.mxu0 %v1653_v61  ;;  %2399 = vmatprep.subr.mxu1 %v1653_v61  ;;  %v1641_v47 = vld [vmem:[#allocation12 + $0x18] sm:$0xff] }
 0x351   : > { %v2553_v51 = vpop.eup %2552  ;;  %2570 = vpow2.f32 %v949_v18  ;;  %2344 = vmatpush3.msra.mxu0 %v1653_v61  ;;  %2415 = vmatpush3.msra.mxu1 %v1653_v61 }
 0x352   : > { %v2555_v52 = vpop.eup %2554  ;;  %1131 = vadd.xlane.f32.xlu0 %v2541_v23  ;;  %2337 = vmatprep.mubr.f32.mxu0 %v2553_v51  ;;  %2572 = vpow2.f32 %v935_v58  ;;  %v1098_v58 = vld [vmem:[#allocation4 + $0x48] sm:$0xff] }
 0x353   : > { %1147 = vadd.xlane.f32.xlu1 %v2555_v52  ;;  %2338 = vmatmul.mubr.f32.gmra.mxu0 %v2555_v52  ;;  %2574 = vpow2.f32 %v951_v22 }
 0x354   : > { %2576 = vpow2.f32 %v937_v4  ;;  %2345 = vmatprep.subr.mxu0 %v1652_v26  ;;  %2400 = vmatprep.subr.mxu1 %v1652_v26 }
 0x355   : > { %v2557_v17 = vpop.eup %2556  ;;  %2578 = vpow2.f32 %v953_v36  ;;  %2346 = vmatpush3.msra.mxu0 %v1652_v26  ;;  %2416 = vmatpush3.msra.mxu1 %v1652_v26 }
 0x356   : > { %v2559_v40 = vpop.eup %2558  ;;  %1133 = vadd.xlane.f32.xlu0 %v2545_v46  ;;  %2340 = vmatprep.mubr.f32.mxu0 %v2557_v17  ;;  %2580 = vpow2.f32 %v939_v37  ;;  %v1645_v46 = vld [vmem:[#allocation12 + $0x38] sm:$0xff] }
 0x357   : > { %1145 = vadd.xlane.f32.xlu1 %v2553_v51  ;;  %2341 = vmatmul.mubr.f32.gmra.mxu0 %v2559_v40  ;;  %v3401_v35 = vpop.eup %2560  ;;  %2582 = vpow2.f32 %v955_v44  ;;  %v1640_v44 = vld [vmem:[#allocation12 + $0x10] sm:$0xff] }
 0x358   : > { %v3406_v55 = vpop.eup %2562  ;;  %2584 = vpow2.f32 %v941_v5  ;;  %2347 = vmatprep.subr.mxu0 %v1651_v39  ;;  %2401 = vmatprep.subr.mxu1 %v1651_v39  ;;  %v1105_v51 = vmul.f32 %v3401_v35, %v1089_v50  ;;  %v1097_v5 = vld [vmem:[#allocation4 + $0x40] sm:$0xff] }
 0x359   : > { %v3413_v2 = vpop.eup %2564  ;;  %2586 = vpow2.f32 %v957_v54  ;;  %2348 = vmatpush3.msra.mxu0 %v1651_v39  ;;  %2417 = vmatpush3.msra.mxu1 %v1651_v39  ;;  %v1113_v54 = vmul.f32 %v3406_v55, %v1097_v5  ;;  %v1101_v50 = vld [vmem:[#allocation4 + $0x60] sm:$0xff] }
 0x35a   : > { %1135 = vadd.xlane.f32.xlu0 %v2547_v3  ;;  %2588 = vpow2.f32 %v943_v34  ;;  %2349 = vmatprep.subr.mxu0 %v1650_v63  ;;  %v1643_v3 = vld [vmem:[#allocation12 + $0x28] sm:$0xff] }
 0x35b   : > { %1151 = vadd.xlane.f32.xlu1 %v2559_v40  ;;  %2590 = vpow2.f32 %v959_v15  ;;  %2402 = vmatprep.subr.mxu1 %v1650_v63  ;;  %v1099_v15 = vld [vmem:[#allocation4 + $0x50] sm:$0xff] }
 0x35c   : > { %v3418_v48 = vpop.eup %2566  ;;  %2350 = vmatpush3.msra.mxu0 %v1650_v63  ;;  %2418 = vmatpush3.msra.mxu1 %v1650_v63  ;;  %v1094_v63 = vld [vmem:[#allocation4 + $0x28] sm:$0xff] }
 0x35d   : > { %v3425_v11 = vpop.eup %2568  ;;  %2351 = vmatprep.subr.mxu0 %v1649_v7  ;;  %2403 = vmatprep.subr.mxu1 %v1649_v7  ;;  %v1114_v62 = vmul.f32 %v3418_v48, %v1098_v58 }
 0x35e   : > { %v3430_v14 = vpop.eup %2570  ;;  %2352 = vmatpush3.msra.mxu0 %v1649_v7  ;;  %2419 = vmatpush3.msra.mxu1 %v1649_v7  ;;  %v1107_v59 = vmul.f32 %v3425_v11, %v1091_v53 }
 0x35f   : > { %1149 = vadd.xlane.f32.xlu1 %v2557_v17  ;;  %v3437_v10 = vpop.eup %2572  ;;  %2353 = vmatprep.subr.mxu0 %v1648_v29  ;;  %v1090_v17 = vld [vmem:[#allocation4 + $0x8] sm:$0xff]  ;;  %v1115_v26 = vmul.f32 %v3430_v14, %v1099_v15 }
 0x360   : > { %v3442_v9 = vpop.eup %2574  ;;  %2404 = vmatprep.subr.mxu1 %v1648_v29  ;;  %2354 = vmatpush3.msra.mxu0 %v1648_v29  ;;  %v1106_v42 = vmul.f32 %v3413_v2, %v1090_v17  ;;  %v1108_v27 = vmul.f32 %v3437_v10, %v1092_v21 }
 0x361   : > { %v3446_v45 = vpop.eup %2576  ;;  %2420 = vmatpush3.msra.mxu1 %v1648_v29  ;;  %2355 = vmatprep.subr.mxu0 %v1647_v43  ;;  %v1102_v29 = vld [vmem:[#allocation4 + $0x68] sm:$0xff] }
 0x362   : > { %v3448_v13 = vpop.eup %2578  ;;  %2405 = vmatprep.subr.mxu1 %v1647_v43  ;;  %2356 = vmatpush3.msra.mxu0 %v1647_v43 }
 0x363   : > { %v3452_v19 = vpop.eup %2580  ;;  %2421 = vmatpush3.msra.mxu1 %v1647_v43  ;;  %2357 = vmatprep.subr.mxu0 %v1646_v41 }
 0x364   : > { %v3454_v24 = vpop.eup %2582  ;;  %2406 = vmatprep.subr.mxu1 %v1646_v41  ;;  %2358 = vmatpush3.msra.mxu0 %v1646_v41 }
 0x365   : > { %v3458_v6 = vpop.eup %2584  ;;  %2422 = vmatpush3.msra.mxu1 %v1646_v41  ;;  %2359 = vmatprep.subr.mxu0 %v1645_v46  ;;  %v1110_v41 = vmul.f32 %v3452_v19, %v1094_v63 }
 0x366   : > { %v3460_v23 = vpop.eup %2586  ;;  %2407 = vmatprep.subr.mxu1 %v1645_v46  ;;  %2360 = vmatpush3.msra.mxu0 %v1645_v46 }
 0x367   : > { %v3464_v12 = vpop.eup %2588  ;;  %2423 = vmatpush3.msra.mxu1 %v1645_v46  ;;  %2361 = vmatprep.subr.mxu0 %v1644_v38 }
 0x368   : > { %v3466_v20 = vpop.eup %2590  ;;  %2408 = vmatprep.subr.mxu1 %v1644_v38  ;;  %2362 = vmatpush3.msra.mxu0 %v1644_v38 }
 0x369   : > { %2424 = vmatpush3.msra.mxu1 %v1644_v38  ;;  %2363 = vmatprep.subr.mxu0 %v1643_v3  ;;  %v1118_v38 = vmul.f32 %v3454_v24, %v1102_v29 }
 0x36a   : > { %2409 = vmatprep.subr.mxu1 %v1643_v3  ;;  %2364 = vmatpush3.msra.mxu0 %v1643_v3 }
 0x36b   : > { %2425 = vmatpush3.msra.mxu1 %v1643_v3  ;;  %2365 = vmatprep.subr.mxu0 %v1642_v30  ;;  %v1095_v3 = vld [vmem:[#allocation4 + $0x30] sm:$0xff] }
 0x36c   : > { %2410 = vmatprep.subr.mxu1 %v1642_v30  ;;  %2366 = vmatpush3.msra.mxu0 %v1642_v30  ;;  %v1111_v17 = vmul.f32 %v3458_v6, %v1095_v3 }
 0x36d   : > { %2426 = vmatpush3.msra.mxu1 %v1642_v30  ;;  %2367 = vmatprep.subr.mxu0 %v1641_v47 }
 0x36e   : > { %2411 = vmatprep.subr.mxu1 %v1641_v47  ;;  %2368 = vmatpush3.msra.mxu0 %v1641_v47 }
 0x36f   : > { %2427 = vmatpush3.msra.mxu1 %v1641_v47  ;;  %2369 = vmatprep.subr.mxu0 %v1640_v44 }
 0x370   : > { %1244 = vperm.xlu1 %2527, %v3406_v55   ;;  %1204 = vperm.xlu0 %2526, %v3401_v35   ;;  %v1100_v35 = vld [vmem:[#allocation4 + $0x58] sm:$0xff] }
 0x371   : > { %v1116_v60 = vmul.f32 %v3442_v9, %v1100_v35  ;;  %2412 = vmatprep.subr.mxu1 %v1640_v44  ;;  %2370 = vmatpush3.msra.mxu0 %v1640_v44 }
 0x372   : > { %2428 = vmatpush3.msra.mxu1 %v1640_v44  ;;  %2371 = vmatprep.subr.mxu0 %v1639_v49 }
 0x373   : > { %2413 = vmatprep.subr.mxu1 %v1639_v49  ;;  %2372 = vmatpush3.msra.mxu0 %v1639_v49 }
 0x374   : > { %1209 = vperm.xlu1 %2527, %v3413_v2   ;;  %1249 = vperm.xlu0 %2526, %v3418_v48  }
 0x375   : > { %2373 = vmatprep.subr.mxu0 %v1638_v1  ;;  %2429 = vmatpush3.msra.mxu1 %v1639_v49 }
 0x376   : > { %2374 = vmatpush3.msra.mxu0 %v1638_v1  ;;  %2414 = vmatprep.subr.mxu1 %v1638_v1 }
 0x377   : > { %2430 = vmatpush3.msra.mxu1 %v1638_v1 }
 0x378   : > { %1214 = vperm.xlu1 %2527, %v3425_v11   ;;  %1254 = vperm.xlu0 %2526, %v3430_v14  }
 0x37c   : > { %1219 = vperm.xlu1 %2527, %v3437_v10   ;;  %1259 = vperm.xlu0 %2526, %v3442_v9   ;;  %v1093_v10 = vld [vmem:[#allocation4 + $0x20] sm:$0xff] }
 0x37d   : > { %v1109_v9 = vmul.f32 %v3446_v45, %v1093_v10 }
 0x380   : > { %1224 = vperm.xlu1 %2527, %v3446_v45   ;;  %1264 = vperm.xlu0 %2526, %v3448_v13  }
 0x384   : > { %1229 = vperm.xlu1 %2527, %v3452_v19   ;;  %1269 = vperm.xlu0 %2526, %v3454_v24   ;;  %v1117_v19 = vmul.f32 %v3448_v13, %v1101_v50 }
 0x388   : > { %1234 = vperm.xlu1 %2527, %v3458_v6   ;;  %1274 = vperm.xlu0 %2526, %v3460_v23  }
 0x38c   : > { %1239 = vperm.xlu1 %2527, %v3464_v12   ;;  %1279 = vperm.xlu0 %2526, %v3466_v20  }
 0x3b3   : > { %v1122_v52 = vpop.xlane.xlu1 %1121 }
 0x3b4   : > { %v1153_v40 = vadd.f32 %v1122_v52, %v1105_v51 }
 0x3b6   : > { %1170 = vst.msk [vmem:[#allocation4] sm:$0xff] %vm616_vm0, %v1153_v40  ;;  %v1096_v40 = vld [vmem:[#allocation4 + $0x38] sm:$0xff] }
 0x3b7   : > { %v1124_v57 = vpop.xlane.xlu0 %1123 }
 0x3b8   : > { %v1154_v31 = vadd.f32 %v1124_v57, %v1106_v42 }
 0x3ba   : > { %1171 = vst.msk [vmem:[#allocation4 + $0x8] sm:$0xff] %vm616_vm0, %v1154_v31  ;;  %v1104_v31 = vld [vmem:[#allocation4 + $0x78] sm:$0xff] }
 0x3bb   : > { %v1128_v33 = vpop.xlane.xlu0 %1127  ;;  %v1120_v6 = vmul.f32 %v3466_v20, %v1104_v31 }
 0x3bc   : > { %v1156_v56 = vadd.f32 %v1128_v33, %v1108_v27  ;;  %v1112_v33 = vmul.f32 %v3464_v12, %v1096_v40 }
 0x3bd   : > { %v1494_v22 = vld [vmem:[#allocation4] sm:$0xff] }
 0x3be   : > { %1173 = vst.msk [vmem:[#allocation4 + $0x18] sm:$0xff] %vm616_vm0, %v1156_v56 }
 0x3bf   : > { %v1126_v18 = vpop.xlane.xlu0 %1125 }
 0x3c0   : > { %v1155_v28 = vadd.f32 %v1126_v18, %v1107_v59  ;;  %v1103_v18 = vld [vmem:[#allocation4 + $0x70] sm:$0xff] }
 0x3c1   : > { %v1495_v0 = vld [vmem:[#allocation4 + $0x8] sm:$0xff]  ;;  %v1119_v12 = vmul.f32 %v3460_v23, %v1103_v18 }
 0x3c2   : > { %1172 = vst.msk [vmem:[#allocation4 + $0x10] sm:$0xff] %vm616_vm0, %v1155_v28  ;;  %2592 = vrcp.f32 %v1495_v0 }
 0x3c3   : > { %2594 = vrcp.f32 %v1494_v22 }
 0x3c5   : > { %v1140_v4 = vpop.xlane.xlu1 %1139  ;;  %v1497_v36 = vld [vmem:[#allocation4 + $0x18] sm:$0xff] }
 0x3c6   : > { %v1162_v32 = vadd.f32 %v1140_v4, %v1114_v62  ;;  %2596 = vrcp.f32 %v1497_v36 }
 0x3c8   : > { %1179 = vst.msk [vmem:[#allocation4 + $0x48] sm:$0xff] %vm616_vm0, %v1162_v32 }
 0x3c9   : > { %v1144_v37 = vpop.xlane.xlu1 %1143  ;;  %v1496_v8 = vld [vmem:[#allocation4 + $0x10] sm:$0xff] }
 0x3ca   : > { %v1164_v2 = vadd.f32 %v1144_v37, %v1116_v60  ;;  %2598 = vrcp.f32 %v1496_v8 }
 0x3cc   : > { %1181 = vst.msk [vmem:[#allocation4 + $0x58] sm:$0xff] %vm616_vm0, %v1164_v2 }
 0x3cf   : > { %v2593_v48 = vpop.eup %2592  ;;  %v1503_v11 = vld [vmem:[#allocation4 + $0x48] sm:$0xff] }
 0x3d0   : > { %1549 = vperm.xlu1 %2527, %v2593_v48   ;;  %2600 = vrcp.f32 %v1503_v11  ;;  %v2595_v25 = vpop.eup %2594 }
 0x3d3   : > { %v1138_v34 = vpop.xlane.xlu0 %1137  ;;  %v2597_v61 = vpop.eup %2596  ;;  %v1505_v42 = vld [vmem:[#allocation4 + $0x58] sm:$0xff] }
 0x3d4   : > { %v1161_v16 = vadd.f32 %v1138_v34, %v1113_v54  ;;  %1544 = vperm.xlu1 %2527, %v2595_v25  }
 0x3d6   : > { %1178 = vst.msk [vmem:[#allocation4 + $0x40] sm:$0xff] %vm616_vm0, %v1161_v16 }
 0x3d7   : > { %v1130_v39 = vpop.xlane.xlu0 %1129  ;;  %v2599_v46 = vpop.eup %2598 }
 0x3d8   : > { %v1142_v7 = vpop.xlane.xlu1 %1141  ;;  %v1157_v55 = vadd.f32 %v1130_v39, %v1109_v9  ;;  %1559 = vperm.xlu1 %2527, %v2597_v61  }
 0x3d9   : > { %v1163_v43 = vadd.f32 %v1142_v7, %v1115_v26 }
 0x3da   : > { %1174 = vst.msk [vmem:[#allocation4 + $0x20] sm:$0xff] %vm616_vm0, %v1157_v55 }
 0x3db   : > { %1180 = vst.msk [vmem:[#allocation4 + $0x50] sm:$0xff] %vm616_vm0, %v1163_v43  ;;  %v1132_v45 = vpop.xlane.xlu0 %1131 }
 0x3dc   : > { %v1148_v30 = vpop.xlane.xlu1 %1147  ;;  %v1158_v14 = vadd.f32 %v1132_v45, %v1110_v41  ;;  %1554 = vperm.xlu1 %2527, %v2599_v46  }
 0x3dd   : > { %v2601_v47 = vpop.eup %2600  ;;  %v1166_v51 = vadd.f32 %v1148_v30, %v1118_v38  ;;  %v1502_v52 = vld [vmem:[#allocation4 + $0x40] sm:$0xff] }
 0x3de   : > { %1175 = vst.msk [vmem:[#allocation4 + $0x28] sm:$0xff] %vm616_vm0, %v1158_v14  ;;  %1589 = vperm.xlu0 %2526, %v2601_v47   ;;  %2602 = vrcp.f32 %v1502_v52 }
 0x3df   : > { %1183 = vst.msk [vmem:[#allocation4 + $0x68] sm:$0xff] %vm616_vm0, %v1166_v51  ;;  %v1134_v24 = vpop.xlane.xlu0 %1133  ;;  %2604 = vrcp.f32 %v1505_v42 }
 0x3e0   : > { %v1146_v57 = vpop.xlane.xlu1 %1145  ;;  %v1159_v21 = vadd.f32 %v1134_v24, %v1111_v17 }
 0x3e1   : > { %v1165_v27 = vadd.f32 %v1146_v57, %v1117_v19  ;;  %v1498_v0 = vld [vmem:[#allocation4 + $0x20] sm:$0xff] }
 0x3e2   : > { %1176 = vst.msk [vmem:[#allocation4 + $0x30] sm:$0xff] %vm616_vm0, %v1159_v21  ;;  %v1504_v53 = vld [vmem:[#allocation4 + $0x50] sm:$0xff] }
 0x3e3   : > { %1182 = vst.msk [vmem:[#allocation4 + $0x60] sm:$0xff] %vm616_vm0, %v1165_v27  ;;  %v1136_v56 = vpop.xlane.xlu0 %1135  ;;  %2606 = vrcp.f32 %v1504_v53 }
 0x3e4   : > { %v1152_v59 = vpop.xlane.xlu1 %1151  ;;  %v1160_v13 = vadd.f32 %v1136_v56, %v1112_v33 }
 0x3e5   : > { %v1168_v28 = vadd.f32 %v1152_v59, %v1120_v6  ;;  %v1499_v58 = vld [vmem:[#allocation4 + $0x28] sm:$0xff] }
 0x3e6   : > { %1177 = vst.msk [vmem:[#allocation4 + $0x38] sm:$0xff] %vm616_vm0, %v1160_v13  ;;  %2608 = vrcp.f32 %v1499_v58  ;;  %v1507_v22 = vld [vmem:[#allocation4 + $0x68] sm:$0xff] }
 0x3e7   : > { %1185 = vst.msk [vmem:[#allocation4 + $0x78] sm:$0xff] %vm616_vm0, %v1168_v28  ;;  %2610 = vrcp.f32 %v1498_v0 }
 0x3e8   : > { %v1150_v62 = vpop.xlane.xlu1 %1149  ;;  %2612 = vrcp.f32 %v1507_v22 }
 0x3e9   : > { %v1167_v4 = vadd.f32 %v1150_v62, %v1119_v12  ;;  %v1500_v20 = vld [vmem:[#allocation4 + $0x30] sm:$0xff] }
 0x3ea   : > { %v1506_v32 = vld [vmem:[#allocation4 + $0x60] sm:$0xff]  ;;  %2614 = vrcp.f32 %v1500_v20 }
 0x3eb   : > { %v2603_v35 = vpop.eup %2602  ;;  %1184 = vst.msk [vmem:[#allocation4 + $0x70] sm:$0xff] %vm616_vm0, %v1167_v4  ;;  %2616 = vrcp.f32 %v1506_v32  ;;  %v1205_v15 = vpop.permute.xlu0 %1204 }
 0x3ec   : > { %1584 = vperm.xlu0 %2526, %v2603_v35   ;;  %v2605_v36 = vpop.eup %2604  ;;  %v1245_v25 = vpop.permute.xlu1 %1244  ;;  %v1282_v45 = vmul.f32 0.0, %v1205_v15 }
 0x3ed   : > { %v1501_v60 = vld [vmem:[#allocation4 + $0x38] sm:$0xff]  ;;  %v1290_v0 = vmul.f32 0.0, %v1245_v25 }
 0x3ee   : > { %2618 = vrcp.f32 %v1501_v60  ;;  %v1509_v8 = vld [vmem:[#allocation4 + $0x78] sm:$0xff]  ;;  %v2321_v7 = vpop.f32.mrf.mxu0 }
 0x3ef   : > { %v1250_v61 = vpop.permute.xlu0 %1249 }
 0x3f0   : > { %1599 = vperm.xlu0 %2526, %v2605_v36   ;;  %v2607_v37 = vpop.eup %2606  ;;  %v1210_v34 = vpop.permute.xlu1 %1209  ;;  %v1291_v22 = vmul.f32 0.0, %v1250_v61 }
 0x3f1   : > { %v1364_v55 = vpop.f32.mrf.mxu0  ;;  %v1283_v46 = vmul.f32 0.0, %v1210_v34 }
 0x3f2   : > { %v1508_v2 = vld [vmem:[#allocation4 + $0x70] sm:$0xff]  ;;  %v1443_v14 = vadd.f32 %v1364_v55, %v1282_v45 }
 0x3f3   : > { %v2609_v23 = vpop.eup %2608  ;;  %2620 = vrcp.f32 %v1508_v2  ;;  %v1255_v39 = vpop.permute.xlu0 %1254  ;;  %v1444_v47 = vadd.f32 %v2321_v7, %v1283_v46 }
 0x3f4   : > { %1594 = vperm.xlu0 %2526, %v2607_v37   ;;  %1569 = vperm.xlu1 %2527, %v2609_v23   ;;  %v2611_v44 = vpop.eup %2610  ;;  %2622 = vrcp.f32 %v1509_v8  ;;  %v1215_v10 = vpop.permute.xlu1 %1214  ;;  %v1292_v37 = vmul.f32 0.0, %v1255_v39 }
 0x3f5   : > { %v2613_v49 = vpop.eup %2612  ;;  %v1284_v57 = vmul.f32 0.0, %v1215_v10 }
 0x3f7   : > { %v2615_v48 = vpop.eup %2614  ;;  %v1260_v29 = vpop.permute.xlu0 %1259 }
 0x3f8   : > { %1609 = vperm.xlu0 %2526, %v2613_v49   ;;  %1564 = vperm.xlu1 %2527, %v2611_v44   ;;  %v2617_v5 = vpop.eup %2616  ;;  %v1220_v16 = vpop.permute.xlu1 %1219  ;;  %v1293_v23 = vmul.f32 0.0, %v1260_v29 }
 0x3f9   : > { %v2324_v41 = vpop.f32.mrf.mxu0  ;;  %v1285_v24 = vmul.f32 0.0, %v1220_v16 }
 0x3fb   : > { %v2619_v11 = vpop.eup %2618  ;;  %v1374_v3 = vpop.f32.mrf.mxu0  ;;  %v1446_v27 = vadd.f32 %v2324_v41, %v1285_v24 }
 0x3fc   : > { %1604 = vperm.xlu0 %2526, %v2617_v5   ;;  %1574 = vperm.xlu1 %2527, %v2615_v48   ;;  %v1225_v9 = vpop.permute.xlu1 %1224  ;;  %v1265_v30 = vpop.permute.xlu0 %1264  ;;  %v1445_v31 = vadd.f32 %v1374_v3, %v1284_v57 }
 0x3fd   : > { %v1294_v61 = vmul.f32 0.0, %v1265_v30 }
 0x3ff   : > { %v2327_v50 = vpop.f32.mrf.mxu0 }
 0x400   : > { %v2621_v1 = vpop.eup %2620  ;;  %1579 = vperm.xlu1 %2527, %v2619_v11   ;;  %v1230_v26 = vpop.permute.xlu1 %1229  ;;  %v1286_v11 = vmul.f32 0.0, %v1225_v9 }
 0x401   : > { %1614 = vperm.xlu0 %2526, %v2621_v1   ;;  %v2623_v54 = vpop.eup %2622  ;;  %v1384_v19 = vpop.f32.mrf.mxu0  ;;  %v1287_v44 = vmul.f32 0.0, %v1230_v26 }
 0x402   : > { %v1270_v40 = vpop.permute.xlu0 %1269  ;;  %v1447_v34 = vadd.f32 %v1384_v19, %v1286_v11  ;;  %v1816_v11 = vld [vmem:[%s3034_s16 + $0x50] sm:$0xff] }
 0x403   : > { %v1448_v10 = vadd.f32 %v2327_v50, %v1287_v44  ;;  %v1295_v29 = vmul.f32 0.0, %v1270_v40 }
 0x404   : > { %v3502_v63 = vpop.permute.xlu1 %1234 }
 0x405   : > { %1619 = vperm.xlu0 %2526, %v2623_v54   ;;  %v1288_v39 = vmul.f32 0.0, %v3502_v63 }
 0x406   : > { %v1275_v56 = vpop.permute.xlu0 %1274 }
 0x407   : > { %v3506_v21 = vpop.f32.mrf.mxu0 }
 0x408   : > { %v3504_v43 = vpop.permute.xlu1 %1239 }
 0x409   : > { %v1394_v53 = vpop.f32.mrf.mxu0  ;;  %v1289_v41 = vmul.f32 0.0, %v3504_v43 }
 0x40a   : > { %v1280_v18 = vpop.permute.xlu0 %1279  ;;  %v1449_v46 = vadd.f32 %v1394_v53, %v1288_v39 }
 0x40b   : > { %v2333_v13 = vpop.f32.mrf.mxu0  ;;  %v1450_v63 = vadd.f32 %v3506_v21, %v1289_v41  ;;  %v1297_v24 = vmul.f32 0.0, %v1280_v18  ;;  %v3514_v21 = vld [vmem:[%s3628_s6] ss:$0 sm:$0xff] }
 0x40c   : > { %v1452_v4 = vadd.f32 %v2333_v13, %v1291_v22  ;;  %v1808_v22 = vld [vmem:[%s3034_s16 + $0x10] sm:$0xff] }
 0x40d   : > { %v1404_v28 = vpop.f32.mrf.mxu0 }
 0x40e   : > { %v1451_v62 = vadd.f32 %v1404_v28, %v1290_v0 }
 0x40f   : > { %v2336_v12 = vpop.f32.mrf.mxu0 }
 0x410   : > { %v1454_v49 = vadd.f32 %v2336_v12, %v1293_v23 }
 0x411   : > { %v1414_v35 = vpop.f32.mrf.mxu0 }
 0x412   : > { %v1453_v8 = vadd.f32 %v1414_v35, %v1292_v37  ;;  %v1814_v37 = vld [vmem:[%s3034_s16 + $0x40] sm:$0xff] }
 0x413   : > { %v2339_v2 = vpop.f32.mrf.mxu0 }
 0x415   : > { %v1424_v1 = vpop.f32.mrf.mxu0 }
 0x416   : > { %v1455_v9 = vadd.f32 %v1424_v1, %v1294_v61  ;;  %v1810_v61 = vld [vmem:[%s3034_s16 + $0x20] sm:$0xff] }
 0x417   : > { %v2342_v7 = vpop.f32.mrf.mxu0 }
 0x44b   : > { %v1550_v38 = vpop.permute.xlu1 %1549 }
 0x44c   : > { %v1623_v17 = vmul.f32 %v1550_v38, %v1444_v47  ;;  %v1456_v38 = vadd.f32 %v2339_v2, %v1295_v29  ;;  %v1819_v29 = vld [vmem:[%s3034_s16 + $0x68] sm:$0xff] }
 0x44f   : > { %v1545_v51 = vpop.permute.xlu1 %1544 }
 0x450   : > { %v1622_v52 = vmul.f32 %v1545_v51, %v1443_v14  ;;  %v1434_v14 = vpop.f32.mrf.mxu0  ;;  %v1296_v51 = vmul.f32 0.0, %v1275_v56  ;;  %v1806_v56 = vld [vmem:[%s3034_s16] sm:$0xff] }
 0x452   : > { %2375 = vmatprep.mubr.f32.mxu0 %v1622_v52  ;;  %v1457_v52 = vadd.f32 %v1434_v14, %v1296_v51  ;;  %v1813_v14 = vld [vmem:[%s3034_s16 + $0x38] sm:$0xff] }
 0x453   : > { %v1560_v42 = vpop.permute.xlu1 %1559  ;;  %2376 = vmatmul.mubr.f32.vlgmr.msra.gmra.mxu0 %v1623_v17 }
 0x454   : > { %v1625_v59 = vmul.f32 %v1560_v42, %v1446_v27  ;;  %v1458_v42 = vadd.f32 %v2342_v7, %v1297_v24 }
 0x457   : > { %v1555_v33 = vpop.permute.xlu1 %1554 }
 0x458   : > { %v1624_v6 = vmul.f32 %v1555_v33, %v1445_v31  ;;  %v1807_v33 = vld [vmem:[%s3034_s16 + $0x8] sm:$0xff] }
 0x459   : > { %v1590_v58 = vpop.permute.xlu0 %1589 }
 0x45a   : > { %2378 = vmatprep.mubr.f32.mxu0 %v1624_v6  ;;  %v1631_v36 = vmul.f32 %v1590_v58, %v1452_v4  ;;  %v1809_v58 = vld [vmem:[%s3034_s16 + $0x18] sm:$0xff] }
 0x45b   : > { %2379 = vmatmul.mubr.f32.gmra.mxu0 %v1625_v59 }
 0x467   : > { %v1585_v20 = vpop.permute.xlu0 %1584 }
 0x468   : > { %v1630_v32 = vmul.f32 %v1585_v20, %v1451_v62 }
 0x46a   : > { %2387 = vmatprep.mubr.f32.mxu1 %v1630_v32  ;;  %v1815_v32 = vld [vmem:[%s3034_s16 + $0x48] sm:$0xff] }
 0x46b   : > { %2388 = vmatmul.mubr.f32.vlgmr.msra.gmra.mxu1 %v1631_v36  ;;  %v1600_v60 = vpop.permute.xlu0 %1599 }
 0x46c   : > { %v1633_v25 = vmul.f32 %v1600_v60, %v1454_v49  ;;  %v1817_v49 = vld [vmem:[%s3034_s16 + $0x58] sm:$0xff] }
 0x46f   : > { %v1570_v48 = vpop.permute.xlu1 %1569  ;;  %v1595_v5 = vpop.permute.xlu0 %1594 }
 0x470   : > { %v1632_v54 = vmul.f32 %v1595_v5, %v1453_v8  ;;  %v1627_v26 = vmul.f32 %v1570_v48, %v1448_v10 }
 0x472   : > { %2390 = vmatprep.mubr.f32.mxu1 %v1632_v54 }
 0x473   : > { %v1565_v16 = vpop.permute.xlu1 %1564  ;;  %2391 = vmatmul.mubr.f32.gmra.mxu1 %v1633_v25  ;;  %v1610_v15 = vpop.permute.xlu0 %1609 }
 0x474   : > { %v1626_v55 = vmul.f32 %v1565_v16, %v1447_v34  ;;  %v1635_v30 = vmul.f32 %v1610_v15, %v1456_v38  ;;  %v1811_v34 = vld [vmem:[%s3034_s16 + $0x28] sm:$0xff] }
 0x476   : > { %2381 = vmatprep.mubr.f32.mxu0 %v1626_v55 }
 0x477   : > { %v1575_v45 = vpop.permute.xlu1 %1574  ;;  %2382 = vmatmul.mubr.f32.gmra.mxu0 %v1627_v26  ;;  %v1605_v3 = vpop.permute.xlu0 %1604 }
 0x478   : > { %v1628_v50 = vmul.f32 %v1575_v45, %v1449_v46  ;;  %v1634_v47 = vmul.f32 %v1605_v3, %v1455_v9  ;;  %v1818_v9 = vld [vmem:[%s3034_s16 + $0x60] sm:$0xff] }
 0x47a   : > { %2384 = vmatprep.mubr.f32.mxu0 %v1628_v50  ;;  %2393 = vmatprep.mubr.f32.mxu1 %v1634_v47 }
 0x47b   : > { %v1580_v17 = vpop.permute.xlu1 %1579  ;;  %2394 = vmatmul.mubr.f32.gmra.mxu1 %v1635_v30  ;;  %v1812_v30 = vld [vmem:[%s3034_s16 + $0x30] sm:$0xff] }
 0x47c   : > { %v1629_v43 = vmul.f32 %v1580_v17, %v1450_v63  ;;  %v1615_v19 = vpop.permute.xlu0 %1614 }
 0x47d   : > { %v1636_v40 = vmul.f32 %v1615_v19, %v1457_v52  ;;  %v1821_v19 = vld [vmem:[%s3034_s16 + $0x78] sm:$0xff] }
 0x47e   : > { %2385 = vmatmul.mubr.f32.gmra.mxu0 %v1629_v43 }
 0x47f   : > { %2396 = vmatprep.mubr.f32.mxu1 %v1636_v40 }
 0x480   : > { %v1620_v57 = vpop.permute.xlu0 %1619 }
 0x481   : > { %v1637_v31 = vmul.f32 %v1620_v57, %v1458_v42  ;;  %v1820_v42 = vld [vmem:[%s3034_s16 + $0x70] sm:$0xff]  ;;  %s2736_s16 = sshll.u32 %s2835_s19, 4  ;;  %s2737_s16 = int_to_ptr.vmem [resolvable:$false] %s2736_s16 }
 0x482   : > { %s2738_s3 = scalar_lea.vmem %s2737_s16, 4096  ;;  %p2739_p2 = scmp.lt.s32.totalorder %s3572_s18, %s2737_s16 }
 0x483   : > { %2397 = vmatmul.mubr.f32.gmra.mxu1 %v1637_v31  ;;  %p2740_p11 = scmp.lt.s32.totalorder %s2738_s3, %s2732_s28 }
 0x485   : > { %p2741_p9 = por %p2740_p11, %p2739_p2 }
 0x487   : > { %p2742_p12 = pnand %p2741_p9, %p2735_p8 }
 0x513   : > { %v2377_v27 = vpop.f32.mrf.mxu0 }
 0x514   : > { %v1733_v53 = vadd.f32 %v2377_v27, %v3514_v21 }
 0x515   : > { %v1727_v6 = vpop.f32.mrf.mxu0 }
 0x516   : > { %v1823_v59 = vadd.f32 %v1807_v33, %v1733_v53  ;;  %v1728_v13 = vadd.f32 %v3514_v21, %v1727_v6 }
 0x518   : > { %1839 = vst [vmem:[%s3521_s20 + $0x8] sm:$0xff] %v1823_v59  ;;  %v1822_v18 = vadd.f32 %v1806_v56, %v1728_v13 }
 0x51a   : > { %1838 = vst [vmem:[%s3521_s20] sm:$0xff] %v1822_v18 }
 0x51b   : > { %v2380_v28 = vpop.f32.mrf.mxu0 }
 0x51c   : > { %v1743_v0 = vadd.f32 %v2380_v28, %v3514_v21 }
 0x51d   : > { %v1737_v12 = vpop.f32.mrf.mxu0 }
 0x51e   : > { %v1825_v62 = vadd.f32 %v1809_v58, %v1743_v0  ;;  %v1738_v4 = vadd.f32 %v3514_v21, %v1737_v12 }
 0x520   : > { %1841 = vst [vmem:[%s3521_s20 + $0x18] sm:$0xff] %v1825_v62  ;;  %v1824_v20 = vadd.f32 %v1808_v22, %v1738_v4 }
 0x522   : > { %1840 = vst [vmem:[%s3521_s20 + $0x10] sm:$0xff] %v1824_v20 }
 0x52b   : > { %v2389_v35 = vpop.f32.mrf.mxu1 }
 0x52c   : > { %v1773_v36 = vadd.f32 %v2389_v35, %v3514_v21 }
 0x52d   : > { %v1767_v60 = vpop.f32.mrf.mxu1 }
 0x52e   : > { %v1831_v2 = vadd.f32 %v1815_v32, %v1773_v36  ;;  %v1768_v23 = vadd.f32 %v3514_v21, %v1767_v60 }
 0x530   : > { %1847 = vst [vmem:[%s3521_s20 + $0x48] sm:$0xff] %v1831_v2  ;;  %v1830_v8 = vadd.f32 %v1814_v37, %v1768_v23 }
 0x532   : > { %1846 = vst [vmem:[%s3521_s20 + $0x40] sm:$0xff] %v1830_v8 }
 0x533   : > { %v2392_v44 = vpop.f32.mrf.mxu1 }
 0x534   : > { %v1783_v48 = vadd.f32 %v2392_v44, %v3514_v21 }
 0x535   : > { %v1777_v5 = vpop.f32.mrf.mxu1 }
 0x536   : > { %v1833_v1 = vadd.f32 %v1817_v49, %v1783_v48  ;;  %v1778_v54 = vadd.f32 %v3514_v21, %v1777_v5 }
 0x537   : > { %v2383_v25 = vpop.f32.mrf.mxu0 }
 0x538   : > { %1849 = vst [vmem:[%s3521_s20 + $0x58] sm:$0xff] %v1833_v1  ;;  %v1832_v10 = vadd.f32 %v1816_v11, %v1778_v54  ;;  %v1753_v16 = vadd.f32 %v2383_v25, %v3514_v21 }
 0x539   : > { %v1747_v15 = vpop.f32.mrf.mxu0 }
 0x53a   : > { %1848 = vst [vmem:[%s3521_s20 + $0x50] sm:$0xff] %v1832_v10  ;;  %v1827_v39 = vadd.f32 %v1811_v34, %v1753_v16  ;;  %v1748_v7 = vadd.f32 %v3514_v21, %v1747_v15 }
 0x53b   : > { %v2395_v55 = vpop.f32.mrf.mxu1 }
 0x53c   : > { %1843 = vst [vmem:[%s3521_s20 + $0x28] sm:$0xff] %v1827_v39  ;;  %v1826_v26 = vadd.f32 %v1810_v61, %v1748_v7  ;;  %v1793_v41 = vadd.f32 %v2395_v55, %v3514_v21 }
 0x53d   : > { %v1787_v46 = vpop.f32.mrf.mxu1 }
 0x53e   : > { %1842 = vst [vmem:[%s3521_s20 + $0x20] sm:$0xff] %v1826_v26  ;;  %v1835_v38 = vadd.f32 %v1819_v29, %v1793_v41  ;;  %v1788_v45 = vadd.f32 %v3514_v21, %v1787_v46  ;;  %v2386_v3 = vpop.f32.mrf.mxu0 }
 0x53f   : > { %v1763_v50 = vadd.f32 %v2386_v3, %v3514_v21 }
 0x540   : > { %1851 = vst [vmem:[%s3521_s20 + $0x68] sm:$0xff] %v1835_v38  ;;  %v1834_v47 = vadd.f32 %v1818_v9, %v1788_v45  ;;  %v1757_v51 = vpop.f32.mrf.mxu0 }
 0x541   : > { %v1829_v63 = vadd.f32 %v1813_v14, %v1763_v50  ;;  %v1758_v52 = vadd.f32 %v3514_v21, %v1757_v51 }
 0x542   : > { %1850 = vst [vmem:[%s3521_s20 + $0x60] sm:$0xff] %v1834_v47 }
 0x543   : > { %1845 = vst [vmem:[%s3521_s20 + $0x38] sm:$0xff] %v1829_v63  ;;  %v1828_v17 = vadd.f32 %v1812_v30, %v1758_v52  ;;  %v2398_v43 = vpop.f32.mrf.mxu1 }
 0x544   : > { %v1803_v24 = vadd.f32 %v2398_v43, %v3514_v21 }
 0x545   : > { %1844 = vst [vmem:[%s3521_s20 + $0x30] sm:$0xff] %v1828_v17  ;;  %v1797_v40 = vpop.f32.mrf.mxu1 }
 0x546   : > { %v1837_v57 = vadd.f32 %v1821_v19, %v1803_v24  ;;  %v1798_v31 = vadd.f32 %v3514_v21, %v1797_v40 }
 0x548   : > { %1853 = vst [vmem:[%s3521_s20 + $0x78] sm:$0xff] %v1837_v57  ;;  %v1836_v27 = vadd.f32 %v1820_v42, %v1798_v31 }
 0x54a   : > { %1852 = vst [vmem:[%s3521_s20 + $0x70] sm:$0xff] %v1836_v27 }
 0x54b   : > { %2745 = shalt.err (!%p2742_p12)
}
 0x54c   : > { %s2746_s11 = scalar_lea.hbm %s3570_s23, 2048  ;;  %s2750_s9 = scalar_lea.hbm %s3629_s7, 4096 }
 0x54d   : > { %p2747_p13 = scmp.ne.s32.totalorder %s3570_s23, %s2746_s11  ;;  %p2751_p10 = scmp.lt.s32.totalorder %s3570_s23, %s3629_s7 }
 0x54e   : > { %p2752_p7 = scmp.lt.s32.totalorder %s2750_s9, %s2746_s11 }
 0x54f   : > { %p2748_p0 = pnand %p2747_p13, %p2975_p3 }
 0x550   : > { %p2753_p1 = por %p2752_p7, %p2751_p10 }
 0x551   : > { %p2749_p5 = pneg %p2748_p0 }
 0x553   : > { %p2754_p4 = pnand %p2753_p1, %p2749_p5 }
 0x555   : > { %2757 = shalt.err (!%p2754_p4)
}
 0x556   : > { %s2836_s5 = smov 128   ;;  %s2837_s17 = smov 8  }
 0x557   : > { %2443 = dma.vmem_to_hbm [thread:$0]  (%p2975_p3), %s3572_s18, 2048, %s3570_s23, %s1855_s27, %s2836_s5, %s2836_s5, %s2837_s17  }
 0x558 PF: > { %s1885_s20 = sand.u32 1, %s2804_s24   ;;  %p3668_p8 = scmp.ge.s32.totalorder %s2824_s29, 2 }
 0x559   : > { %s1886_s15 = scalar_lea.sflag [#allocation8], %s1885_s20 }
 0x55a   : > { %p2460_p2 = pnand %p3668_p8, %p2923_p6 }
 0x55c   : > { %p2461_p11 = pneg %p2460_p2 }
 0x55e   : > { %2799 = dma.done.wait (%p2461_p11), %s1886_s15, 2048  }
 0x55f   : > { %2801 = vsyncadd (%p2461_p11), %s1886_s15, 4294965248  ;;  %s27_s29 = sadd.s32 1, %s2824_s29   ;;  %s3669_s27 = sld [smem:[#allocation20_spill]] }
 0x560   : > { %p24_p9 = scmp.ge.s32.totalorder %s27_s29, 4   ;;  %s3670_s28 = sld [smem:[#allocation21_spill]] }
 0x561   : > { %s3671_s24 = smov %s2808_s25  ;;  %s3672_s25 = smov %s2812_s26 }
 0x562   : > { %s3673_s26 = smov %s2986_s21  ;;  %26 = sbr.rel (!%p24_p9) target bundleno = 14 (0xe), region = 125 }
 0x567   :  { %1891 = vsyncpa [#allocation7], 1 }
 0x568   :  { %1893 = vsyncpa [#allocation7 + $0x1], 1 }
 0x569   :  { %1894 = vsyncpa [#allocation10], 1 }
 0x56a   :  { %1896 = vsyncpa [#allocation10 + $0x1], 1 }
 0x56b   :  { %1897 = vsyncpa [#allocation13], 1 }
 0x56c   :  { %1898 = vsyncpa [#allocation8], 1 }
 0x56d   :  { %1900 = vsyncpa [#allocation8 + $0x1], 1 }

</bundles_post_ra>
